<compile_context>
chip_gen: v7x
topology: tpu7x:2x2x1
jax: 0.10.0
libtpu: 0.0.40
codegen_flags: <defaults>
</compile_context>

<pallas_src>
import jax
import jax.numpy as jnp
from jax.experimental import pallas as pl
from jax.experimental.pallas import tpu as pltpu

N_EMBD = 128
N_HEAD = 6
HEAD_SIZE = N_EMBD // N_HEAD  # 21  (so proj is Linear(126, 128))
LN_EPS = 1e-5


def _layernorm(v, gamma, beta):
    mu = jnp.mean(v, axis=-1, keepdims=True)
    var = jnp.mean((v - mu) ** 2, axis=-1, keepdims=True)
    return (v - mu) * jax.lax.rsqrt(var + LN_EPS) * gamma + beta


def block_kernel(x_ref, mask_ref,
                 ln1_g_ref, ln1_b_ref,
                 m_ref, n_ref, bproj_ref,
                 ln2_g_ref, ln2_b_ref,
                 w1_ref, b1_ref, w2_ref, b2_ref,
                 o_ref,
                 h_sc, hm_sc, x1_sc):
    Bt, T, C = x_ref.shape
    R = Bt * T

    x = x_ref[...].astype(jnp.float32).reshape(R, C)           # (R, C) slab

    # --- LayerNorm 1 on the whole slab ---
    h = _layernorm(x, ln1_g_ref[0], ln1_b_ref[0])
    h_sc[...] = h

    # --- Folded QK projection for all heads: one (R,C)@(C,H*C) slab matmul ---
    hm_sc[...] = jnp.dot(h.astype(m_ref.dtype), m_ref[...],
                         preferred_element_type=jnp.float32)   # (R, H*C)

    add_mask = mask_ref[...]                                   # (H*T, T) 0/-1e30
    bproj = bproj_ref[0]

    def attend_one_batch(b, start):
        hb = h_sc[pl.ds(start, T), :]                          # (T, C) keys/vals
        hm_b = hm_sc[pl.ds(start, T), :]                       # (T, H*C) queries
        # Head-major stack of folded queries: (H*T, C).  128-aligned lane
        # slices + sublane concat (cheap repack, no relayout reshape).
        qa = jnp.concatenate(
            [hm_b[:, hd * C:(hd + 1) * C] for hd in range(N_HEAD)], axis=0)
        # One score matmul for all heads (transposed-RHS path, no hb.T copy).
        s = jax.lax.dot_general(qa, hb, (((1,), (1,)), ((), ())),
                                preferred_element_type=jnp.float32)  # (H*T, T)
        s = s + add_mask
        s = s - jnp.max(s, axis=-1, keepdims=True)
        e = jnp.exp(s)
        p = e / jnp.sum(e, axis=-1, keepdims=True)             # exact division
        # One PV matmul for all heads: (H*T,T)@(T,C).
        pv = jnp.dot(p, hb, preferred_element_type=jnp.float32)        # (H*T, C)
        # Back to (T, H*C) lane layout (128-aligned lane concat), then one
        # folded V*proj matmul with N stacked along rows.
        pv_r = jnp.concatenate(
            [pv[hd * T:(hd + 1) * T, :] for hd in range(N_HEAD)], axis=1)
        sa = jnp.dot(pv_r.astype(n_ref.dtype), n_ref[...],
                     preferred_element_type=jnp.float32)                # (T, C)
        # TODO(synk): dropout (p=0.2) omitted — eval-mode identity.
        x1_sc[pl.ds(start, T), :] = x_ref[b].astype(jnp.float32) + sa + bproj

    if Bt <= 8:
        for b in range(Bt):                                    # small static unroll
            attend_one_batch(b, b * T)
    else:
        def body(b, carry):
            attend_one_batch(b, pl.multiple_of(b * T, 8))
            return carry
        jax.lax.fori_loop(0, Bt, body, 0)

    # --- LayerNorm 2 + FeedForward on the whole slab ---
    x1 = x1_sc[...]
    h2 = _layernorm(x1, ln2_g_ref[0], ln2_b_ref[0])
    ff = jnp.dot(h2.astype(w1_ref.dtype), w1_ref[...],
                 preferred_element_type=jnp.float32) + b1_ref[0]
    ff = jnp.maximum(ff, 0.0)
    ff = jnp.dot(ff.astype(w2_ref.dtype), w2_ref[...],
                 preferred_element_type=jnp.float32) + b2_ref[0]

    o_ref[...] = (x1 + ff).reshape(Bt, T, C).astype(o_ref.dtype)


def _choose_bt(B, T):
    """Batches per grid step.  Target Bt*T ~ 1024 rows per step (VMEM is not
    the binding resource here); no minimum-grid-steps constraint.  Only merge
    batches when the (Bt,T,C)->(Bt*T,C) reshape is layout-free (T % 8 == 0)."""
    if T % 8 != 0:
        return 1
    cap = max(1, 1024 // T)
    bt = 1
    for cand in range(1, min(B, cap) + 1):
        if B % cand == 0:
            bt = cand
    return bt


def fold_params(params, weight_dtype=jnp.float32):
    """Fold per-head projections once (cache the result alongside params).
      m_all   (C, H*C): per-head Wq @ Wk^T * head_size**-0.5, heads on lanes
      n_stack (H*C, C): per-head Wv @ Wproj, heads stacked along rows
    weight_dtype=jnp.bfloat16 halves the weight DMA (f32 accumulation kept)."""
    (ln1_g, ln1_b, wq, wk, wv, wp, bp, ln2_g, ln2_b, w1, b1, w2, b2) = params
    scale = float(HEAD_SIZE) ** -0.5
    m_all = jnp.concatenate(
        [wq[h] @ wk[h].T * scale for h in range(N_HEAD)], axis=1)
    n_stack = jnp.concatenate(
        [wv[h] @ wp[h] for h in range(N_HEAD)], axis=0)
    return dict(
        ln1_g=ln1_g, ln1_b=ln1_b,
        m_all=m_all.astype(weight_dtype), n_stack=n_stack.astype(weight_dtype),
        bproj=bp, ln2_g=ln2_g, ln2_b=ln2_b,
        w1=w1.astype(weight_dtype), b1=b1,
        w2=w2.astype(weight_dtype), b2=b2)


def transformer_block(x, f):
    B, T, C = x.shape
    assert C == N_EMBD

    Bt = _choose_bt(B, T)
    R = Bt * T
    grid = (B // Bt,)

    # Additive causal mask in the head-major (h*T + t) row ordering.
    t_idx = jnp.tile(jnp.arange(T), N_HEAD)
    attn_mask = jnp.where(t_idx[:, None] >= jnp.arange(T)[None, :],
                          0.0, -1e30).astype(jnp.float32)      # (H*T, T)

    def full(a):
        nd = a.ndim
        return pl.BlockSpec(a.shape, lambda g, _nd=nd: (0,) * _nd)

    in_specs = [
        pl.BlockSpec((Bt, T, C), lambda g: (g, 0, 0)),          # x
        full(attn_mask),                                        # causal bias
        full(f['ln1_g']), full(f['ln1_b']),                     # ln1
        full(f['m_all']),                                       # folded QK^T
        full(f['n_stack']),                                     # folded V*proj
        full(f['bproj']),                                       # proj bias
        full(f['ln2_g']), full(f['ln2_b']),                     # ln2
        full(f['w1']), full(f['b1']),                           # ffn W1, b1
        full(f['w2']), full(f['b2']),                           # ffn W2, b2
    ]

    scratch_shapes = [
        pltpu.VMEM((R, C), jnp.float32),              # h (post-LN1)
        pltpu.VMEM((R, N_HEAD * C), jnp.float32),     # folded queries
        pltpu.VMEM((R, C), jnp.float32),              # x1 residual
    ]

    return pl.pallas_call(
        block_kernel,
        out_shape=jax.ShapeDtypeStruct((B, T, C), x.dtype),
        grid_spec=pltpu.PrefetchScalarGridSpec(
            num_scalar_prefetch=0,
            grid=grid,
            in_specs=in_specs,
            out_specs=pl.BlockSpec((Bt, T, C), lambda g: (g, 0, 0)),
            scratch_shapes=scratch_shapes,
        ),
        compiler_params=pltpu.CompilerParams(
            dimension_semantics=("parallel",)),
    )(x, attn_mask, f['ln1_g'], f['ln1_b'], f['m_all'], f['n_stack'],
      f['bproj'], f['ln2_g'], f['ln2_b'], f['w1'], f['b1'], f['w2'], f['b2'])


def reference_block(x, params):
    (ln1_g, ln1_b, wq, wk, wv, wp, bp, ln2_g, ln2_b, w1, b1, w2, b2) = params
    x = x.astype(jnp.float32)
    h = _layernorm(x, ln1_g[0], ln1_b[0])
    T = x.shape[1]
    mask = jnp.tril(jnp.ones((T, T), bool))
    outs = []
    for hd in range(N_HEAD):
        q = h @ wq[hd]
        k = h @ wk[hd]
        v = h @ wv[hd]
        wei = (q @ jnp.swapaxes(k, -1, -2)) * (HEAD_SIZE ** -0.5)
        wei = jnp.where(mask, wei, -jnp.inf)
        wei = jax.nn.softmax(wei, axis=-1)
        outs.append(wei @ v)
    cat = jnp.concatenate(outs, axis=-1)                                # (B,T,126)
    proj_w = jnp.concatenate([wp[hd] for hd in range(N_HEAD)], axis=0)  # (126, C)
    x1 = x + cat @ proj_w + bp[0]
    h2 = _layernorm(x1, ln2_g[0], ln2_b[0])
    ff = jnp.maximum(h2 @ w1 + b1[0], 0.0) @ w2 + b2[0]
    return x1 + ff


def make_params(key):
    ks = jax.random.split(key, 10)
    C, H, S = N_EMBD, N_HEAD, HEAD_SIZE
    s = 0.02
    params = (
        jnp.ones((1, C), jnp.float32),                                  # ln1 gamma
        jnp.zeros((1, C), jnp.float32),                                 # ln1 beta
        jax.random.normal(ks[0], (H, C, S), jnp.float32) * s,           # Wq
        jax.random.normal(ks[1], (H, C, S), jnp.float32) * s,           # Wk
        jax.random.normal(ks[2], (H, C, S), jnp.float32) * s,           # Wv
        jax.random.normal(ks[3], (H, S, C), jnp.float32) * s,           # Wproj
        jax.random.normal(ks[4], (1, C), jnp.float32) * s,              # bproj
        jnp.ones((1, C), jnp.float32),                                  # ln2 gamma
        jnp.zeros((1, C), jnp.float32),                                 # ln2 beta
        jax.random.normal(ks[5], (C, 4 * C), jnp.float32) * s,          # W1
        jax.random.normal(ks[6], (1, 4 * C), jnp.float32) * s,          # b1
        jax.random.normal(ks[7], (4 * C, C), jnp.float32) * s,          # W2
        jax.random.normal(ks[8], (1, C), jnp.float32) * s,              # b2
    )
    return params


if __name__ == "__main__":
    key = jax.random.PRNGKey(0)
    kx, kp, kx2 = jax.random.split(key, 3)

    params = make_params(kp)
    folded_f32 = fold_params(params, jnp.float32)     # precomputed once, cached

    # Primary small test (batch=2, seq=8) -> Bt=2, grid=(1,).
    B, T = 2, 8
    x = jax.random.normal(kx, (B, T, N_EMBD), jnp.float32)
    out = jax.block_until_ready(transformer_block(x, folded_f32))
    ref = reference_block(x, params)
    assert out.shape == (B, T, N_EMBD)
    err = float(jnp.max(jnp.abs(out - ref)))
    assert err < 5e-4, err

    # Secondary check exercising a larger multi-batch slab (Bt=4, grid=(1,)).
    B2, T2 = 4, 16
    x2 = jax.random.normal(kx2, (B2, T2, N_EMBD), jnp.float32)
    out2 = jax.block_until_ready(transformer_block(x2, folded_f32))
    ref2 = reference_block(x2, params)
    err2 = float(jnp.max(jnp.abs(out2 - ref2)))
    assert err2 < 5e-4, err2

    # Optional bf16 weight-slab path (halves weight DMA on v5e/v6e);
    # f32 accumulation, looser tolerance (not bit-exact with PyTorch).
    folded_bf16 = fold_params(params, jnp.bfloat16)
    out_bf = jax.block_until_ready(transformer_block(x2, folded_bf16))
    err_bf = float(jnp.max(jnp.abs(out_bf - ref2)))
    assert err_bf < 2e-2, err_bf

    print("KERNEL_OK")
</pallas_src>

<mosaic_0001>
module attributes {stable_mosaic.version = 11 : i64} {
  func.func @block_kernel(%arg0: i32, %arg1: memref<2x8x128xf32, #tpu.memory_space<vmem>>, %arg2: memref<48x8xf32, #tpu.memory_space<vmem>>, %arg3: memref<1x128xf32, #tpu.memory_space<vmem>>, %arg4: memref<1x128xf32, #tpu.memory_space<vmem>>, %arg5: memref<128x768xf32, #tpu.memory_space<vmem>>, %arg6: memref<768x128xf32, #tpu.memory_space<vmem>>, %arg7: memref<1x128xf32, #tpu.memory_space<vmem>>, %arg8: memref<1x128xf32, #tpu.memory_space<vmem>>, %arg9: memref<1x128xf32, #tpu.memory_space<vmem>>, %arg10: memref<128x512xf32, #tpu.memory_space<vmem>>, %arg11: memref<1x512xf32, #tpu.memory_space<vmem>>, %arg12: memref<512x128xf32, #tpu.memory_space<vmem>>, %arg13: memref<1x128xf32, #tpu.memory_space<vmem>>, %arg14: memref<2x8x128xf32, #tpu.memory_space<vmem>>, %arg15: memref<16x128xf32, #tpu.memory_space<vmem>>, %arg16: memref<16x768xf32, #tpu.memory_space<vmem>>, %arg17: memref<16x128xf32, #tpu.memory_space<vmem>>) attributes {dimension_semantics = [#tpu.dimension_semantics<parallel>], iteration_bounds = array<i64: 1>, scalar_prefetch = 0 : i64, scratch_operands = 3 : i64, tpu.core_type = #tpu.core_type<tc>, window_params = [{transform_indices = @transform_0, window_bounds = array<i64: 2, 8, 128>}, {pipeline_mode = #tpu.pipeline_mode<synchronous>, transform_indices = @transform_1, window_bounds = array<i64: 48, 8>}, {pipeline_mode = #tpu.pipeline_mode<synchronous>, transform_indices = @transform_2, window_bounds = array<i64: 1, 128>}, {pipeline_mode = #tpu.pipeline_mode<synchronous>, transform_indices = @transform_3, window_bounds = array<i64: 1, 128>}, {pipeline_mode = #tpu.pipeline_mode<synchronous>, transform_indices = @transform_4, window_bounds = array<i64: 128, 768>}, {pipeline_mode = #tpu.pipeline_mode<synchronous>, transform_indices = @transform_5, window_bounds = array<i64: 768, 128>}, {pipeline_mode = #tpu.pipeline_mode<synchronous>, transform_indices = @transform_6, window_bounds = array<i64: 1, 128>}, {pipeline_mode = #tpu.pipeline_mode<synchronous>, transform_indices = @transform_7, window_bounds = array<i64: 1, 128>}, {pipeline_mode = #tpu.pipeline_mode<synchronous>, transform_indices = @transform_8, window_bounds = array<i64: 1, 128>}, {pipeline_mode = #tpu.pipeline_mode<synchronous>, transform_indices = @transform_9, window_bounds = array<i64: 128, 512>}, {pipeline_mode = #tpu.pipeline_mode<synchronous>, transform_indices = @transform_10, window_bounds = array<i64: 1, 512>}, {pipeline_mode = #tpu.pipeline_mode<synchronous>, transform_indices = @transform_11, window_bounds = array<i64: 512, 128>}, {pipeline_mode = #tpu.pipeline_mode<synchronous>, transform_indices = @transform_12, window_bounds = array<i64: 1, 128>}, {transform_indices = @transform_13, window_bounds = array<i64: 2, 8, 128>}]} {
    %c0 = arith.constant 0 : index
    %c0_0 = arith.constant 0 : index
    %c0_1 = arith.constant 0 : index
    %0 = vector.load %arg1[%c0, %c0_0, %c0_1] : memref<2x8x128xf32, #tpu.memory_space<vmem>>, vector<2x8x128xf32>
    %1 = vector.shape_cast %0 : vector<2x8x128xf32> to vector<16x128xf32>
    %c0_2 = arith.constant 0 : index
    %c0_3 = arith.constant 0 : index
    %2 = vector.load %arg3[%c0_2, %c0_3] : memref<1x128xf32, #tpu.memory_space<vmem>>, vector<1x128xf32>
    %3 = vector.shape_cast %2 : vector<1x128xf32> to vector<128xf32>
    %c0_4 = arith.constant 0 : index
    %c0_5 = arith.constant 0 : index
    %4 = vector.load %arg4[%c0_4, %c0_5] : memref<1x128xf32, #tpu.memory_space<vmem>>, vector<1x128xf32>
    %5 = vector.shape_cast %4 : vector<1x128xf32> to vector<128xf32>
    %cst = arith.constant dense<0.000000e+00> : vector<16xf32>
    %6 = vector.multi_reduction <add>, %1, %cst [1] : vector<16x128xf32> to vector<16xf32>
    %7 = vector.shape_cast %6 : vector<16xf32> to vector<16x1xf32>
    %cst_6 = arith.constant 1.280000e+02 : f32
    %8 = vector.broadcast %cst_6 : f32 to vector<16x1xf32>
    %9 = arith.divf %7, %8 : vector<16x1xf32>
    %10 = vector.broadcast %9 : vector<16x1xf32> to vector<16x128xf32>
    %11 = arith.subf %1, %10 : vector<16x128xf32>
    %12 = arith.mulf %11, %11 : vector<16x128xf32>
    %cst_7 = arith.constant dense<0.000000e+00> : vector<16xf32>
    %13 = vector.multi_reduction <add>, %12, %cst_7 [1] : vector<16x128xf32> to vector<16xf32>
    %14 = vector.shape_cast %13 : vector<16xf32> to vector<16x1xf32>
    %cst_8 = arith.constant 1.280000e+02 : f32
    %15 = vector.broadcast %cst_8 : f32 to vector<16x1xf32>
    %16 = arith.divf %14, %15 : vector<16x1xf32>
    %17 = vector.broadcast %9 : vector<16x1xf32> to vector<16x128xf32>
    %18 = arith.subf %1, %17 : vector<16x128xf32>
    %cst_9 = arith.constant 9.99999974E-6 : f32
    %19 = vector.broadcast %cst_9 : f32 to vector<16x1xf32>
    %20 = arith.addf %16, %19 : vector<16x1xf32>
    %21 = math.rsqrt %20 : vector<16x1xf32>
    %22 = vector.broadcast %21 : vector<16x1xf32> to vector<16x128xf32>
    %23 = arith.mulf %18, %22 : vector<16x128xf32>
    %24 = vector.shape_cast %3 : vector<128xf32> to vector<1x128xf32>
    %25 = vector.broadcast %24 : vector<1x128xf32> to vector<16x128xf32>
    %26 = arith.mulf %23, %25 : vector<16x128xf32>
    %27 = vector.shape_cast %5 : vector<128xf32> to vector<1x128xf32>
    %28 = vector.broadcast %27 : vector<1x128xf32> to vector<16x128xf32>
    %29 = arith.addf %26, %28 : vector<16x128xf32>
    %c0_10 = arith.constant 0 : index
    %c0_11 = arith.constant 0 : index
    %30 = vector.load %arg15[%c0_10, %c0_11] : memref<16x128xf32, #tpu.memory_space<vmem>>, vector<16x128xf32>
    tpu.vector_store %arg15[%c0_10, %c0_11], %29 {strides = array<i32>} : memref<16x128xf32, #tpu.memory_space<vmem>>, vector<16x128xf32>,
    %c0_12 = arith.constant 0 : index
    %c0_13 = arith.constant 0 : index
    %31 = vector.load %arg5[%c0_12, %c0_13] : memref<128x768xf32, #tpu.memory_space<vmem>>, vector<128x768xf32>
    %cst_14 = arith.constant dense<0.000000e+00> : vector<16x768xf32>
    %32 = tpu.matmul %29, %31, %cst_14 {dimension_numbers = #tpu.dot_dimension_numbers<[1], [0], [0], [1], [0, 0, 1, 1], [], []>} : vector<16x128xf32>, vector<128x768xf32>, vector<16x768xf32> -> vector<16x768xf32>
    %c0_15 = arith.constant 0 : index
    %c0_16 = arith.constant 0 : index
    %33 = vector.load %arg16[%c0_15, %c0_16] : memref<16x768xf32, #tpu.memory_space<vmem>>, vector<16x768xf32>
    tpu.vector_store %arg16[%c0_15, %c0_16], %32 {strides = array<i32>} : memref<16x768xf32, #tpu.memory_space<vmem>>, vector<16x768xf32>,
    %c0_17 = arith.constant 0 : index
    %c0_18 = arith.constant 0 : index
    %34 = vector.load %arg2[%c0_17, %c0_18] : memref<48x8xf32, #tpu.memory_space<vmem>>, vector<48x8xf32>
    %c0_19 = arith.constant 0 : index
    %c0_20 = arith.constant 0 : index
    %35 = vector.load %arg7[%c0_19, %c0_20] : memref<1x128xf32, #tpu.memory_space<vmem>>, vector<1x128xf32>
    %36 = vector.shape_cast %35 : vector<1x128xf32> to vector<128xf32>
    %c0_21 = arith.constant 0 : index
    %c0_22 = arith.constant 0 : index
    %37 = vector.load %arg15[%c0_21, %c0_22] : memref<16x128xf32, #tpu.memory_space<vmem>>, vector<8x128xf32>
    %c0_23 = arith.constant 0 : index
    %c0_24 = arith.constant 0 : index
    %38 = vector.load %arg16[%c0_23, %c0_24] : memref<16x768xf32, #tpu.memory_space<vmem>>, vector<8x768xf32>
    %39 = vector.extract_strided_slice %38 {offsets = [0, 0], sizes = [8, 128], strides = [1, 1]} : vector<8x768xf32> to vector<8x128xf32>
    %40 = vector.extract_strided_slice %38 {offsets = [0, 128], sizes = [8, 128], strides = [1, 1]} : vector<8x768xf32> to vector<8x128xf32>
    %41 = vector.extract_strided_slice %38 {offsets = [0, 256], sizes = [8, 128], strides = [1, 1]} : vector<8x768xf32> to vector<8x128xf32>
    %42 = vector.extract_strided_slice %38 {offsets = [0, 384], sizes = [8, 128], strides = [1, 1]} : vector<8x768xf32> to vector<8x128xf32>
    %43 = vector.extract_strided_slice %38 {offsets = [0, 512], sizes = [8, 128], strides = [1, 1]} : vector<8x768xf32> to vector<8x128xf32>
    %44 = vector.extract_strided_slice %38 {offsets = [0, 640], sizes = [8, 128], strides = [1, 1]} : vector<8x768xf32> to vector<8x128xf32>
    %45 = tpu.concatenate %39, %40, %41, %42, %43, %44 in 0 : vector<8x128xf32>, vector<8x128xf32>, vector<8x128xf32>, vector<8x128xf32>, vector<8x128xf32>, vector<8x128xf32> -> vector<48x128xf32>
    %cst_25 = arith.constant dense<0.000000e+00> : vector<48x8xf32>
    %46 = tpu.matmul %45, %37, %cst_25 {dimension_numbers = #tpu.dot_dimension_numbers<[1], [1], [0], [0], [0, 0, 1, 0], [], []>} : vector<48x128xf32>, vector<8x128xf32>, vector<48x8xf32> -> vector<48x8xf32>
    %47 = arith.addf %46, %34 : vector<48x8xf32>
    %cst_26 = arith.constant dense<0xFF800000> : vector<48xf32>
    %48 = vector.multi_reduction <maximumf>, %47, %cst_26 [1] : vector<48x8xf32> to vector<48xf32>
    %49 = vector.shape_cast %48 : vector<48xf32> to vector<48x1xf32>
    %50 = vector.broadcast %49 : vector<48x1xf32> to vector<48x8xf32>
    %51 = arith.subf %47, %50 : vector<48x8xf32>
    %52 = math.exp %51 : vector<48x8xf32>
    %cst_27 = arith.constant dense<0.000000e+00> : vector<48xf32>
    %53 = vector.multi_reduction <add>, %52, %cst_27 [1] : vector<48x8xf32> to vector<48xf32>
    %54 = vector.shape_cast %53 : vector<48xf32> to vector<48x1xf32>
    %55 = vector.broadcast %54 : vector<48x1xf32> to vector<48x8xf32>
    %56 = arith.divf %52, %55 : vector<48x8xf32>
    %cst_28 = arith.constant dense<0.000000e+00> : vector<48x128xf32>
    %57 = tpu.matmul %56, %37, %cst_28 {dimension_numbers = #tpu.dot_dimension_numbers<[1], [0], [0], [1], [0, 0, 1, 1], [], []>} : vector<48x8xf32>, vector<8x128xf32>, vector<48x128xf32> -> vector<48x128xf32>
    %58 = vector.extract_strided_slice %57 {offsets = [0, 0], sizes = [8, 128], strides = [1, 1]} : vector<48x128xf32> to vector<8x128xf32>
    %59 = vector.extract_strided_slice %57 {offsets = [8, 0], sizes = [8, 128], strides = [1, 1]} : vector<48x128xf32> to vector<8x128xf32>
    %60 = vector.extract_strided_slice %57 {offsets = [16, 0], sizes = [8, 128], strides = [1, 1]} : vector<48x128xf32> to vector<8x128xf32>
    %61 = vector.extract_strided_slice %57 {offsets = [24, 0], sizes = [8, 128], strides = [1, 1]} : vector<48x128xf32> to vector<8x128xf32>
    %62 = vector.extract_strided_slice %57 {offsets = [32, 0], sizes = [8, 128], strides = [1, 1]} : vector<48x128xf32> to vector<8x128xf32>
    %63 = vector.extract_strided_slice %57 {offsets = [40, 0], sizes = [8, 128], strides = [1, 1]} : vector<48x128xf32> to vector<8x128xf32>
    %64 = tpu.concatenate %58, %59, %60, %61, %62, %63 in 1 : vector<8x128xf32>, vector<8x128xf32>, vector<8x128xf32>, vector<8x128xf32>, vector<8x128xf32>, vector<8x128xf32> -> vector<8x768xf32>
    %c0_29 = arith.constant 0 : index
    %c0_30 = arith.constant 0 : index
    %65 = vector.load %arg6[%c0_29, %c0_30] : memref<768x128xf32, #tpu.memory_space<vmem>>, vector<768x128xf32>
    %cst_31 = arith.constant dense<0.000000e+00> : vector<8x128xf32>
    %66 = tpu.matmul %64, %65, %cst_31 {dimension_numbers = #tpu.dot_dimension_numbers<[1], [0], [0], [1], [0, 0, 1, 1], [], []>} : vector<8x768xf32>, vector<768x128xf32>, vector<8x128xf32> -> vector<8x128xf32>
    %c0_32 = arith.constant 0 : index
    %c0_33 = arith.constant 0 : index
    %c0_34 = arith.constant 0 : index
    %67 = vector.load %arg1[%c0_32, %c0_33, %c0_34] : memref<2x8x128xf32, #tpu.memory_space<vmem>>, vector<1x8x128xf32>
    %68 = vector.shape_cast %67 : vector<1x8x128xf32> to vector<8x128xf32>
    %69 = arith.addf %68, %66 : vector<8x128xf32>
    %70 = vector.shape_cast %36 : vector<128xf32> to vector<1x128xf32>
    %71 = vector.broadcast %70 : vector<1x128xf32> to vector<8x128xf32>
    %72 = arith.addf %69, %71 : vector<8x128xf32>
    %c0_35 = arith.constant 0 : index
    %c0_36 = arith.constant 0 : index
    %73 = vector.load %arg17[%c0_35, %c0_36] : memref<16x128xf32, #tpu.memory_space<vmem>>, vector<8x128xf32>
    tpu.vector_store %arg17[%c0_35, %c0_36], %72 {strides = array<i32>} : memref<16x128xf32, #tpu.memory_space<vmem>>, vector<8x128xf32>,
    %c8 = arith.constant 8 : index
    %c0_37 = arith.constant 0 : index
    %74 = vector.load %arg15[%c8, %c0_37] : memref<16x128xf32, #tpu.memory_space<vmem>>, vector<8x128xf32>
    %c8_38 = arith.constant 8 : index
    %c0_39 = arith.constant 0 : index
    %75 = vector.load %arg16[%c8_38, %c0_39] : memref<16x768xf32, #tpu.memory_space<vmem>>, vector<8x768xf32>
    %76 = vector.extract_strided_slice %75 {offsets = [0, 0], sizes = [8, 128], strides = [1, 1]} : vector<8x768xf32> to vector<8x128xf32>
    %77 = vector.extract_strided_slice %75 {offsets = [0, 128], sizes = [8, 128], strides = [1, 1]} : vector<8x768xf32> to vector<8x128xf32>
    %78 = vector.extract_strided_slice %75 {offsets = [0, 256], sizes = [8, 128], strides = [1, 1]} : vector<8x768xf32> to vector<8x128xf32>
    %79 = vector.extract_strided_slice %75 {offsets = [0, 384], sizes = [8, 128], strides = [1, 1]} : vector<8x768xf32> to vector<8x128xf32>
    %80 = vector.extract_strided_slice %75 {offsets = [0, 512], sizes = [8, 128], strides = [1, 1]} : vector<8x768xf32> to vector<8x128xf32>
    %81 = vector.extract_strided_slice %75 {offsets = [0, 640], sizes = [8, 128], strides = [1, 1]} : vector<8x768xf32> to vector<8x128xf32>
    %82 = tpu.concatenate %76, %77, %78, %79, %80, %81 in 0 : vector<8x128xf32>, vector<8x128xf32>, vector<8x128xf32>, vector<8x128xf32>, vector<8x128xf32>, vector<8x128xf32> -> vector<48x128xf32>
    %cst_40 = arith.constant dense<0.000000e+00> : vector<48x8xf32>
    %83 = tpu.matmul %82, %74, %cst_40 {dimension_numbers = #tpu.dot_dimension_numbers<[1], [1], [0], [0], [0, 0, 1, 0], [], []>} : vector<48x128xf32>, vector<8x128xf32>, vector<48x8xf32> -> vector<48x8xf32>
    %84 = arith.addf %83, %34 : vector<48x8xf32>
    %cst_41 = arith.constant dense<0xFF800000> : vector<48xf32>
    %85 = vector.multi_reduction <maximumf>, %84, %cst_41 [1] : vector<48x8xf32> to vector<48xf32>
    %86 = vector.shape_cast %85 : vector<48xf32> to vector<48x1xf32>
    %87 = vector.broadcast %86 : vector<48x1xf32> to vector<48x8xf32>
    %88 = arith.subf %84, %87 : vector<48x8xf32>
    %89 = math.exp %88 : vector<48x8xf32>
    %cst_42 = arith.constant dense<0.000000e+00> : vector<48xf32>
    %90 = vector.multi_reduction <add>, %89, %cst_42 [1] : vector<48x8xf32> to vector<48xf32>
    %91 = vector.shape_cast %90 : vector<48xf32> to vector<48x1xf32>
    %92 = vector.broadcast %91 : vector<48x1xf32> to vector<48x8xf32>
    %93 = arith.divf %89, %92 : vector<48x8xf32>
    %cst_43 = arith.constant dense<0.000000e+00> : vector<48x128xf32>
    %94 = tpu.matmul %93, %74, %cst_43 {dimension_numbers = #tpu.dot_dimension_numbers<[1], [0], [0], [1], [0, 0, 1, 1], [], []>} : vector<48x8xf32>, vector<8x128xf32>, vector<48x128xf32> -> vector<48x128xf32>
    %95 = vector.extract_strided_slice %94 {offsets = [0, 0], sizes = [8, 128], strides = [1, 1]} : vector<48x128xf32> to vector<8x128xf32>
    %96 = vector.extract_strided_slice %94 {offsets = [8, 0], sizes = [8, 128], strides = [1, 1]} : vector<48x128xf32> to vector<8x128xf32>
    %97 = vector.extract_strided_slice %94 {offsets = [16, 0], sizes = [8, 128], strides = [1, 1]} : vector<48x128xf32> to vector<8x128xf32>
    %98 = vector.extract_strided_slice %94 {offsets = [24, 0], sizes = [8, 128], strides = [1, 1]} : vector<48x128xf32> to vector<8x128xf32>
    %99 = vector.extract_strided_slice %94 {offsets = [32, 0], sizes = [8, 128], strides = [1, 1]} : vector<48x128xf32> to vector<8x128xf32>
    %100 = vector.extract_strided_slice %94 {offsets = [40, 0], sizes = [8, 128], strides = [1, 1]} : vector<48x128xf32> to vector<8x128xf32>
    %101 = tpu.concatenate %95, %96, %97, %98, %99, %100 in 1 : vector<8x128xf32>, vector<8x128xf32>, vector<8x128xf32>, vector<8x128xf32>, vector<8x128xf32>, vector<8x128xf32> -> vector<8x768xf32>
    %c0_44 = arith.constant 0 : index
    %c0_45 = arith.constant 0 : index
    %102 = vector.load %arg6[%c0_44, %c0_45] : memref<768x128xf32, #tpu.memory_space<vmem>>, vector<768x128xf32>
    %cst_46 = arith.constant dense<0.000000e+00> : vector<8x128xf32>
    %103 = tpu.matmul %101, %102, %cst_46 {dimension_numbers = #tpu.dot_dimension_numbers<[1], [0], [0], [1], [0, 0, 1, 1], [], []>} : vector<8x768xf32>, vector<768x128xf32>, vector<8x128xf32> -> vector<8x128xf32>
    %c1 = arith.constant 1 : index
    %c0_47 = arith.constant 0 : index
    %c0_48 = arith.constant 0 : index
    %104 = vector.load %arg1[%c1, %c0_47, %c0_48] : memref<2x8x128xf32, #tpu.memory_space<vmem>>, vector<1x8x128xf32>
    %105 = vector.shape_cast %104 : vector<1x8x128xf32> to vector<8x128xf32>
    %106 = arith.addf %105, %103 : vector<8x128xf32>
    %107 = vector.shape_cast %36 : vector<128xf32> to vector<1x128xf32>
    %108 = vector.broadcast %107 : vector<1x128xf32> to vector<8x128xf32>
    %109 = arith.addf %106, %108 : vector<8x128xf32>
    %c8_49 = arith.constant 8 : index
    %c0_50 = arith.constant 0 : index
    %110 = vector.load %arg17[%c8_49, %c0_50] : memref<16x128xf32, #tpu.memory_space<vmem>>, vector<8x128xf32>
    tpu.vector_store %arg17[%c8_49, %c0_50], %109 {strides = array<i32>} : memref<16x128xf32, #tpu.memory_space<vmem>>, vector<8x128xf32>,
    %c0_51 = arith.constant 0 : index
    %c0_52 = arith.constant 0 : index
    %111 = vector.load %arg17[%c0_51, %c0_52] : memref<16x128xf32, #tpu.memory_space<vmem>>, vector<16x128xf32>
    %c0_53 = arith.constant 0 : index
    %c0_54 = arith.constant 0 : index
    %112 = vector.load %arg8[%c0_53, %c0_54] : memref<1x128xf32, #tpu.memory_space<vmem>>, vector<1x128xf32>
    %113 = vector.shape_cast %112 : vector<1x128xf32> to vector<128xf32>
    %c0_55 = arith.constant 0 : index
    %c0_56 = arith.constant 0 : index
    %114 = vector.load %arg9[%c0_55, %c0_56] : memref<1x128xf32, #tpu.memory_space<vmem>>, vector<1x128xf32>
    %115 = vector.shape_cast %114 : vector<1x128xf32> to vector<128xf32>
    %cst_57 = arith.constant dense<0.000000e+00> : vector<16xf32>
    %116 = vector.multi_reduction <add>, %111, %cst_57 [1] : vector<16x128xf32> to vector<16xf32>
    %117 = vector.shape_cast %116 : vector<16xf32> to vector<16x1xf32>
    %cst_58 = arith.constant 1.280000e+02 : f32
    %118 = vector.broadcast %cst_58 : f32 to vector<16x1xf32>
    %119 = arith.divf %117, %118 : vector<16x1xf32>
    %120 = vector.broadcast %119 : vector<16x1xf32> to vector<16x128xf32>
    %121 = arith.subf %111, %120 : vector<16x128xf32>
    %122 = arith.mulf %121, %121 : vector<16x128xf32>
    %cst_59 = arith.constant dense<0.000000e+00> : vector<16xf32>
    %123 = vector.multi_reduction <add>, %122, %cst_59 [1] : vector<16x128xf32> to vector<16xf32>
    %124 = vector.shape_cast %123 : vector<16xf32> to vector<16x1xf32>
    %cst_60 = arith.constant 1.280000e+02 : f32
    %125 = vector.broadcast %cst_60 : f32 to vector<16x1xf32>
    %126 = arith.divf %124, %125 : vector<16x1xf32>
    %127 = vector.broadcast %119 : vector<16x1xf32> to vector<16x128xf32>
    %128 = arith.subf %111, %127 : vector<16x128xf32>
    %cst_61 = arith.constant 9.99999974E-6 : f32
    %129 = vector.broadcast %cst_61 : f32 to vector<16x1xf32>
    %130 = arith.addf %126, %129 : vector<16x1xf32>
    %131 = math.rsqrt %130 : vector<16x1xf32>
    %132 = vector.broadcast %131 : vector<16x1xf32> to vector<16x128xf32>
    %133 = arith.mulf %128, %132 : vector<16x128xf32>
    %134 = vector.shape_cast %113 : vector<128xf32> to vector<1x128xf32>
    %135 = vector.broadcast %134 : vector<1x128xf32> to vector<16x128xf32>
    %136 = arith.mulf %133, %135 : vector<16x128xf32>
    %137 = vector.shape_cast %115 : vector<128xf32> to vector<1x128xf32>
    %138 = vector.broadcast %137 : vector<1x128xf32> to vector<16x128xf32>
    %139 = arith.addf %136, %138 : vector<16x128xf32>
    %c0_62 = arith.constant 0 : index
    %c0_63 = arith.constant 0 : index
    %140 = vector.load %arg10[%c0_62, %c0_63] : memref<128x512xf32, #tpu.memory_space<vmem>>, vector<128x512xf32>
    %cst_64 = arith.constant dense<0.000000e+00> : vector<16x512xf32>
    %141 = tpu.matmul %139, %140, %cst_64 {dimension_numbers = #tpu.dot_dimension_numbers<[1], [0], [0], [1], [0, 0, 1, 1], [], []>} : vector<16x128xf32>, vector<128x512xf32>, vector<16x512xf32> -> vector<16x512xf32>
    %c0_65 = arith.constant 0 : index
    %c0_66 = arith.constant 0 : index
    %142 = vector.load %arg11[%c0_65, %c0_66] : memref<1x512xf32, #tpu.memory_space<vmem>>, vector<1x512xf32>
    %143 = vector.shape_cast %142 : vector<1x512xf32> to vector<512xf32>
    %144 = vector.shape_cast %143 : vector<512xf32> to vector<1x512xf32>
    %145 = vector.broadcast %144 : vector<1x512xf32> to vector<16x512xf32>
    %146 = arith.addf %141, %145 : vector<16x512xf32>
    %cst_67 = arith.constant 0.000000e+00 : f32
    %147 = vector.broadcast %cst_67 : f32 to vector<16x512xf32>
    %148 = arith.maximumf %146, %147 : vector<16x512xf32>
    %c0_68 = arith.constant 0 : index
    %c0_69 = arith.constant 0 : index
    %149 = vector.load %arg12[%c0_68, %c0_69] : memref<512x128xf32, #tpu.memory_space<vmem>>, vector<512x128xf32>
    %cst_70 = arith.constant dense<0.000000e+00> : vector<16x128xf32>
    %150 = tpu.matmul %148, %149, %cst_70 {dimension_numbers = #tpu.dot_dimension_numbers<[1], [0], [0], [1], [0, 0, 1, 1], [], []>} : vector<16x512xf32>, vector<512x128xf32>, vector<16x128xf32> -> vector<16x128xf32>
    %c0_71 = arith.constant 0 : index
    %c0_72 = arith.constant 0 : index
    %151 = vector.load %arg13[%c0_71, %c0_72] : memref<1x128xf32, #tpu.memory_space<vmem>>, vector<1x128xf32>
    %152 = vector.shape_cast %151 : vector<1x128xf32> to vector<128xf32>
    %153 = vector.shape_cast %152 : vector<128xf32> to vector<1x128xf32>
    %154 = vector.broadcast %153 : vector<1x128xf32> to vector<16x128xf32>
    %155 = arith.addf %150, %154 : vector<16x128xf32>
    %156 = arith.addf %111, %155 : vector<16x128xf32>
    %157 = vector.shape_cast %156 : vector<16x128xf32> to vector<2x8x128xf32>
    %c0_73 = arith.constant 0 : index
    %c0_74 = arith.constant 0 : index
    %c0_75 = arith.constant 0 : index
    %158 = vector.load %arg14[%c0_73, %c0_74, %c0_75] : memref<2x8x128xf32, #tpu.memory_space<vmem>>, vector<2x8x128xf32>
    tpu.vector_store %arg14[%c0_73, %c0_74, %c0_75], %157 {strides = array<i32>} : memref<2x8x128xf32, #tpu.memory_space<vmem>>, vector<2x8x128xf32>,
    return
  }
  func.func @transform_0(%arg0: i32) -> (i32, i32, i32) {
    %c0_i32 = arith.constant 0 : i32
    %c0_i32_0 = arith.constant 0 : i32
    %c0_i32_1 = arith.constant 0 : i32
    return %arg0, %c0_i32, %c0_i32_0 : i32, i32, i32
  }
  func.func @transform_1(%arg0: i32) -> (i32, i32) {
    %c0_i32 = arith.constant 0 : i32
    %c0_i32_0 = arith.constant 0 : i32
    %c0_i32_1 = arith.constant 0 : i32
    return %c0_i32, %c0_i32_0 : i32, i32
  }
  func.func @transform_2(%arg0: i32) -> (i32, i32) {
    %c0_i32 = arith.constant 0 : i32
    %c0_i32_0 = arith.constant 0 : i32
    %c0_i32_1 = arith.constant 0 : i32
    return %c0_i32, %c0_i32_0 : i32, i32
  }
  func.func @transform_3(%arg0: i32) -> (i32, i32) {
    %c0_i32 = arith.constant 0 : i32
    %c0_i32_0 = arith.constant 0 : i32
    %c0_i32_1 = arith.constant 0 : i32
    return %c0_i32, %c0_i32_0 : i32, i32
  }
  func.func @transform_4(%arg0: i32) -> (i32, i32) {
    %c0_i32 = arith.constant 0 : i32
    %c0_i32_0 = arith.constant 0 : i32
    %c0_i32_1 = arith.constant 0 : i32
    return %c0_i32, %c0_i32_0 : i32, i32
  }
  func.func @transform_5(%arg0: i32) -> (i32, i32) {
    %c0_i32 = arith.constant 0 : i32
    %c0_i32_0 = arith.constant 0 : i32
    %c0_i32_1 = arith.constant 0 : i32
    return %c0_i32, %c0_i32_0 : i32, i32
  }
  func.func @transform_6(%arg0: i32) -> (i32, i32) {
    %c0_i32 = arith.constant 0 : i32
    %c0_i32_0 = arith.constant 0 : i32
    %c0_i32_1 = arith.constant 0 : i32
    return %c0_i32, %c0_i32_0 : i32, i32
  }
  func.func @transform_7(%arg0: i32) -> (i32, i32) {
    %c0_i32 = arith.constant 0 : i32
    %c0_i32_0 = arith.constant 0 : i32
    %c0_i32_1 = arith.constant 0 : i32
    return %c0_i32, %c0_i32_0 : i32, i32
  }
  func.func @transform_8(%arg0: i32) -> (i32, i32) {
    %c0_i32 = arith.constant 0 : i32
    %c0_i32_0 = arith.constant 0 : i32
    %c0_i32_1 = arith.constant 0 : i32
    return %c0_i32, %c0_i32_0 : i32, i32
  }
  func.func @transform_9(%arg0: i32) -> (i32, i32) {
    %c0_i32 = arith.constant 0 : i32
    %c0_i32_0 = arith.constant 0 : i32
    %c0_i32_1 = arith.constant 0 : i32
    return %c0_i32, %c0_i32_0 : i32, i32
  }
  func.func @transform_10(%arg0: i32) -> (i32, i32) {
    %c0_i32 = arith.constant 0 : i32
    %c0_i32_0 = arith.constant 0 : i32
    %c0_i32_1 = arith.constant 0 : i32
    return %c0_i32, %c0_i32_0 : i32, i32
  }
  func.func @transform_11(%arg0: i32) -> (i32, i32) {
    %c0_i32 = arith.constant 0 : i32
    %c0_i32_0 = arith.constant 0 : i32
    %c0_i32_1 = arith.constant 0 : i32
    return %c0_i32, %c0_i32_0 : i32, i32
  }
  func.func @transform_12(%arg0: i32) -> (i32, i32) {
    %c0_i32 = arith.constant 0 : i32
    %c0_i32_0 = arith.constant 0 : i32
    %c0_i32_1 = arith.constant 0 : i32
    return %c0_i32, %c0_i32_0 : i32, i32
  }
  func.func @transform_13(%arg0: i32) -> (i32, i32, i32) {
    %c0_i32 = arith.constant 0 : i32
    %c0_i32_0 = arith.constant 0 : i32
    %c0_i32_1 = arith.constant 0 : i32
    return %arg0, %c0_i32, %c0_i32_0 : i32, i32, i32
  }
}

</mosaic_0001>

<bundles_post_ra>
// kernel: tpu_custom_call.1
= control target key start
LH: loop header
LB: loop body
LE: loop exit
PB: predicated region body
PF: predicated region fallthrough
CT: control target
= control target key end

     0   :  { %18 = vsyncpa [#allocation6], 0  ;;  %s3766_s0 = inlined_call_operand.vmem [shape: f32[2,8,128], index: 0, kind: input, shape index: {}]   ;;  %s3767_s1 = inlined_call_operand.vmem [shape: f32[48,8], index: 1, kind: input, shape index: {}]   ;;  %s3768_s2 = inlined_call_operand.vmem [shape: f32[1,128], index: 2, kind: input, shape index: {}]   ;;  %s3769_s3 = inlined_call_operand.vmem [shape: f32[1,128], index: 3, kind: input, shape index: {}]   ;;  %s3770_s4 = inlined_call_operand.hbm [shape: f32[128,768], index: 4, kind: input, shape index: {}]   ;;  %s3771_s5 = inlined_call_operand.hbm [shape: f32[768,128], index: 5, kind: input, shape index: {}]   ;;  %s3772_s6 = inlined_call_operand.vmem [shape: f32[1,128], index: 6, kind: input, shape index: {}]   ;;  %s3773_s7 = inlined_call_operand.vmem [shape: f32[1,128], index: 7, kind: input, shape index: {}]   ;;  %s3774_s8 = inlined_call_operand.vmem [shape: f32[1,128], index: 8, kind: input, shape index: {}]   ;;  %s3775_s9 = inlined_call_operand.hbm [shape: f32[128,512], index: 9, kind: input, shape index: {}]   ;;  %s3776_s10 = inlined_call_operand.vmem [shape: f32[1,512], index: 10, kind: input, shape index: {}]   ;;  %s3777_s11 = inlined_call_operand.hbm [shape: f32[512,128], index: 11, kind: input, shape index: {}]   ;;  %s3778_s12 = inlined_call_operand.vmem [shape: f32[1,128], index: 12, kind: input, shape index: {}]   ;;  %s3779_s13 = inlined_call_operand.hbm [shape: f32[2,8,128], index: 13, kind: output, shape index: {}]  }
   0x1   :  { %19 = vsyncpa [#allocation9], 0 }
   0x2   :  { %20 = vsyncpa [#allocation12], 0 }
   0x3   :  { %21 = vsyncpa [#allocation7], 0  ;;  %s3194_s25 = smov [#allocation8]   ;;  %s3076_s29 = scalar_lea.hbm %s3771_s5, 12288 }
   0x4   :  { %s47_s26 = sshll.u32 %s3194_s25, 4  ;;  %p3077_p0 = scmp.ne.s32.totalorder %s3771_s5, %s3076_s29  ;;  %s48_s26 = int_to_ptr.vmem [resolvable:$true] %s47_s26 }
   0x5   :  { %p3080_p1 = scmp.lt.u32.totalorder %s3076_s29, %s3771_s5 }
   0x7   :  { %p3082_p2 = pnand %p3080_p1, %p3077_p0 }
   0x9   :  { %3085 = shalt.err (!%p3082_p2)
}
   0xa   :  { %s3086_s17 = scalar_lea.vmem %s48_s26, 12288  ;;  %p3091_p4 = scmp.lt.s32.totalorder %s48_s26, %s48_s26 }
   0xb   :  { %p3087_p3 = scmp.ne.s32.totalorder %s48_s26, %s3086_s17  ;;  %p3092_p5 = scmp.lt.s32.totalorder %s3086_s17, %s3086_s17 }
   0xd   :  { %p3093_p6 = por %p3092_p5, %p3091_p4 }
   0xf   :  { %p3094_p7 = pnand %p3093_p6, %p3087_p3 }
  0x11   :  { %3097 = shalt.err (!%p3094_p7)
}
  0x12   :  { %s3195_s18 = smov 128   ;;  %s3196_s19 = smov 8  }
  0x13   :  { %53 = dma.hbm_to_vmem [thread:$0]  %s3771_s5, 12288, %s48_s26, [#allocation9], %s3195_s18, %s3195_s18, %s3196_s19  }
  0x14   :  { %s3197_s22 = smov [#allocation5]   ;;  %s3098_s27 = scalar_lea.hbm %s3770_s4, 12288 }
  0x15   :  { %s35_s23 = sshll.u32 %s3197_s22, 4  ;;  %p3099_p8 = scmp.ne.s32.totalorder %s3770_s4, %s3098_s27  ;;  %s36_s23 = int_to_ptr.vmem [resolvable:$true] %s35_s23 }
  0x16   :  { %p3102_p9 = scmp.lt.u32.totalorder %s3098_s27, %s3770_s4 }
  0x18   :  { %p3104_p10 = pnand %p3102_p9, %p3099_p8 }
  0x1a   :  { %3107 = shalt.err (!%p3104_p10)
}
  0x1b   :  { %s3108_s15 = scalar_lea.vmem %s36_s23, 12288  ;;  %p3113_p12 = scmp.lt.s32.totalorder %s36_s23, %s36_s23 }
  0x1c   :  { %p3109_p11 = scmp.ne.s32.totalorder %s36_s23, %s3108_s15  ;;  %p3114_p13 = scmp.lt.s32.totalorder %s3108_s15, %s3108_s15 }
  0x1e   :  { %p3115_p0 = por %p3114_p13, %p3113_p12 }
  0x20   :  { %p3116_p1 = pnand %p3115_p0, %p3109_p11 }
  0x22   :  { %3119 = shalt.err (!%p3116_p1)
}
  0x23   :  { %s3198_s5 = smov 768   ;;  %s3199_s26 = smov 48  }
  0x24   :  { %41 = dma.hbm_to_vmem [thread:$0]  %s3770_s4, 12288, %s36_s23, [#allocation6], %s3198_s5, %s3198_s5, %s3199_s26  }
  0x25   :  { %s3200_s20 = smov [#allocation10]   ;;  %s3120_s25 = scalar_lea.hbm %s3775_s9, 8192 }
  0x26   :  { %s65_s21 = sshll.u32 %s3200_s20, 4  ;;  %p3121_p2 = scmp.ne.s32.totalorder %s3775_s9, %s3120_s25  ;;  %s66_s21 = int_to_ptr.vmem [resolvable:$true] %s65_s21 }
  0x27   :  { %p3124_p3 = scmp.lt.u32.totalorder %s3120_s25, %s3775_s9 }
  0x29   :  { %p3126_p4 = pnand %p3124_p3, %p3121_p2 }
  0x2b   :  { %3129 = shalt.err (!%p3126_p4)
}
  0x2c   :  { %s3130_s14 = scalar_lea.vmem %s66_s21, 8192  ;;  %p3135_p6 = scmp.lt.s32.totalorder %s66_s21, %s66_s21 }
  0x2d   :  { %p3131_p5 = scmp.ne.s32.totalorder %s66_s21, %s3130_s14  ;;  %p3136_p7 = scmp.lt.s32.totalorder %s3130_s14, %s3130_s14 }
  0x2f   :  { %p3137_p8 = por %p3136_p7, %p3135_p6 }
  0x31   :  { %p3138_p9 = pnand %p3137_p8, %p3131_p5 }
  0x33   :  { %3141 = shalt.err (!%p3138_p9)
}
  0x34   :  { %s3201_s4 = smov 512   ;;  %s3202_s23 = smov 32  }
  0x35   :  { %71 = dma.hbm_to_vmem [thread:$0]  %s3775_s9, 8192, %s66_s21, [#allocation9], %s3201_s4, %s3201_s4, %s3202_s23  }
  0x36   :  { %s3203_s26 = smov [#allocation11]   ;;  %s3142_s22 = scalar_lea.hbm %s3777_s11, 8192 }
  0x37   :  { %s79_s16 = sshll.u32 %s3203_s26, 4  ;;  %p3143_p10 = scmp.ne.s32.totalorder %s3777_s11, %s3142_s22  ;;  %s80_s16 = int_to_ptr.vmem [resolvable:$true] %s79_s16 }
  0x38   :  { %p3146_p11 = scmp.lt.u32.totalorder %s3142_s22, %s3777_s11 }
  0x3a   :  { %p3148_p12 = pnand %p3146_p11, %p3143_p10 }
  0x3c   :  { %3151 = shalt.err (!%p3148_p12)
}
  0x3d   :  { %s3152_s29 = scalar_lea.vmem %s80_s16, 8192  ;;  %p3157_p0 = scmp.lt.s32.totalorder %s80_s16, %s80_s16 }
  0x3e   :  { %p3153_p13 = scmp.ne.s32.totalorder %s80_s16, %s3152_s29  ;;  %p3158_p1 = scmp.lt.s32.totalorder %s3152_s29, %s3152_s29 }
  0x40   :  { %p3159_p2 = por %p3158_p1, %p3157_p0 }
  0x42   :  { %p3160_p3 = pnand %p3159_p2, %p3153_p13 }
  0x44   :  { %3163 = shalt.err (!%p3160_p3)
}
  0x45   :  { %85 = dma.hbm_to_vmem [thread:$0]  %s3777_s11, 8192, %s80_s16, [#allocation12], %s3195_s18, %s3195_s18, %s3196_s19  }
  0x46   :  { %3186 = dma.done.wait [#allocation6], 12288  }
  0x47   :  { %3187 = vsyncadd [#allocation6], 4294955008 }
  0x48   :  { %3188 = dma.done.wait [#allocation9], 20480  }
  0x49   :  { %3189 = vsyncadd [#allocation9], 4294946816 }
  0x4a   :  { %3190 = dma.done.wait [#allocation12], 8192  }
  0x4b   :  { %3191 = vsyncadd [#allocation12], 4294959104  ;;  %v100_v0 = vld [vmem:[%s3766_s0] sm:$0xff]  ;;  %v3336_v1 = vld [vmem:[%s3766_s0 + $0x8] sm:$0xff]  ;;  %vm593_vm0 = vcmask 64512  }
  0x4c   :  { %104 = vadd.xlane.f32.xlu0 %v100_v0  ;;  %v148_v2 = vld [vmem:[#allocation5 + $0x18] sm:$0xff]  ;;  %v154_v3 = vld [vmem:[#allocation5 + $0x48] sm:$0xff]  ;;  %v147_v4 = vld [vmem:[#allocation5 + $0x10] sm:$0xff] }
  0x4d   :  { %v2624_v5 = vpack.c.bf16 %v154_v3, %v148_v2  ;;  %v153_v6 = vld [vmem:[#allocation5 + $0x40] sm:$0xff]  ;;  %v146_v7 = vld [vmem:[#allocation5 + $0x8] sm:$0xff]  ;;  %v152_v8 = vld [vmem:[#allocation5 + $0x38] sm:$0xff] }
  0x4e   :  { %v2626_v9 = vpack.c.bf16 %v153_v6, %v147_v4  ;;  %v2592_v10 = vpack.c.bf16 %v152_v8, %v146_v7  ;;  %v160_v11 = vld [vmem:[#allocation5 + $0x78] sm:$0xff]  ;;  %v166_v12 = vld [vmem:[#allocation5 + $0xa8] sm:$0xff]  ;;  %v145_v13 = vld [vmem:[#allocation5] sm:$0xff] }
  0x4f   :  { %2625 = vmatprep.subr.bf16.mxu1 %v2624_v5  ;;  %v2628_v14 = vpack.c.bf16 %v166_v12, %v160_v11  ;;  %v151_v15 = vld [vmem:[#allocation5 + $0x30] sm:$0xff]  ;;  %v165_v17 = vld [vmem:[#allocation5 + $0xa0] sm:$0xff]  ;;  %v158_v20 = vld [vmem:[#allocation5 + $0x68] sm:$0xff] }
  0x50   :  { %106 = vadd.xlane.f32.xlu0 %v3336_v1  ;;  %v159_v16 = vld [vmem:[#allocation5 + $0x70] sm:$0xff]  ;;  %2627 = vmatpush1.bf16.msra.mxu1 %v2626_v9  ;;  %v2594_v18 = vpack.c.bf16 %v151_v15, %v145_v13  ;;  %v164_v21 = vld [vmem:[#allocation5 + $0x98] sm:$0xff]  ;;  %v178_v24 = vld [vmem:[#allocation5 + $0x108] sm:$0xff] }
  0x51   :  { %2593 = vmatprep.subr.bf16.mxu0 %v2592_v10  ;;  %v2630_v19 = vpack.c.bf16 %v165_v17, %v159_v16  ;;  %v172_v22 = vld [vmem:[#allocation5 + $0xd8] sm:$0xff]  ;;  %2629 = vmatprep.subr.bf16.mxu1 %v2628_v14  ;;  %v2596_v23 = vpack.c.bf16 %v164_v21, %v158_v20  ;;  %v157_v25 = vld [vmem:[#allocation5 + $0x60] sm:$0xff]  ;;  %v163_v26 = vld [vmem:[#allocation5 + $0x90] sm:$0xff] }
  0x52   :  { %2595 = vmatpush1.bf16.msra.mxu0 %v2594_v18  ;;  %v2632_v27 = vpack.c.bf16 %v178_v24, %v172_v22  ;;  %v2598_v28 = vpack.c.bf16 %v163_v26, %v157_v25  ;;  %v171_v29 = vld [vmem:[#allocation5 + $0xd0] sm:$0xff]  ;;  %v177_v30 = vld [vmem:[#allocation5 + $0x100] sm:$0xff]  ;;  %v170_v31 = vld [vmem:[#allocation5 + $0xc8] sm:$0xff] }
  0x53   :  { %2597 = vmatprep.subr.bf16.mxu0 %v2596_v23  ;;  %v176_v32 = vld [vmem:[#allocation5 + $0xf8] sm:$0xff]  ;;  %v190_v34 = vld [vmem:[#allocation5 + $0x168] sm:$0xff]  ;;  %v2634_v35 = vpack.c.bf16 %v177_v30, %v171_v29  ;;  %v169_v37 = vld [vmem:[#allocation5 + $0xc0] sm:$0xff] }
  0x54   :  { %v184_v33 = vld [vmem:[#allocation5 + $0x138] sm:$0xff]  ;;  %2631 = vmatpush1.bf16.msra.mxu1 %v2630_v19  ;;  %v2600_v36 = vpack.c.bf16 %v176_v32, %v170_v31  ;;  %v175_v38 = vld [vmem:[#allocation5 + $0xf0] sm:$0xff]  ;;  %v189_v41 = vld [vmem:[#allocation5 + $0x160] sm:$0xff] }
  0x55   :  { %2633 = vmatprep.subr.bf16.mxu1 %v2632_v27  ;;  %v2636_v39 = vpack.c.bf16 %v190_v34, %v184_v33  ;;  %v183_v40 = vld [vmem:[#allocation5 + $0x130] sm:$0xff]  ;;  %v2602_v42 = vpack.c.bf16 %v175_v38, %v169_v37  ;;  %v182_v52 = vld [vmem:[#allocation5 + $0x128] sm:$0xff]  ;;  %v188_v53 = vld [vmem:[#allocation5 + $0x158] sm:$0xff] }
  0x56   :  { %2599 = vmatpush1.bf16.msra.mxu0 %v2598_v28  ;;  %v2638_v43 = vpack.c.bf16 %v189_v41, %v183_v40  ;;  %v196_v54 = vld [vmem:[#allocation5 + $0x198] sm:$0xff]  ;;  %v2604_v55 = vpack.c.bf16 %v188_v53, %v182_v52  ;;  %v202_v56 = vld [vmem:[#allocation5 + $0x1c8] sm:$0xff]  ;;  %v181_v57 = vld [vmem:[#allocation5 + $0x120] sm:$0xff] }
  0x57   :  { %2601 = vmatprep.subr.bf16.mxu0 %v2600_v36  ;;  %v187_v58 = vld [vmem:[#allocation5 + $0x150] sm:$0xff]  ;;  %v2640_v59 = vpack.c.bf16 %v202_v56, %v196_v54  ;;  %v201_v62 = vld [vmem:[#allocation5 + $0x1c0] sm:$0xff]  ;;  %v208_v2 = vld [vmem:[#allocation5 + $0x1f8] sm:$0xff] }
  0x58   :  { %2635 = vmatpush1.bf16.msra.mxu1 %v2634_v35  ;;  %v2606_v60 = vpack.c.bf16 %v187_v58, %v181_v57  ;;  %v195_v61 = vld [vmem:[#allocation5 + $0x190] sm:$0xff]  ;;  %v214_v4 = vld [vmem:[#allocation5 + $0x228] sm:$0xff]  ;;  %v193_v5 = vld [vmem:[#allocation5 + $0x180] sm:$0xff] }
  0x59   :  { %2637 = vmatprep.subr.bf16.mxu1 %v2636_v39  ;;  %v2642_v63 = vpack.c.bf16 %v201_v62, %v195_v61  ;;  %v199_v6 = vld [vmem:[#allocation5 + $0x1b0] sm:$0xff]  ;;  %v2644_v7 = vpack.c.bf16 %v214_v4, %v208_v2  ;;  %v213_v10 = vld [vmem:[#allocation5 + $0x220] sm:$0xff]  ;;  %v206_v12 = vld [vmem:[#allocation5 + $0x1e8] sm:$0xff] }
  0x5a   :  { %2603 = vmatpush1.bf16.msra.mxu0 %v2602_v42  ;;  %v2610_v8 = vpack.c.bf16 %v199_v6, %v193_v5  ;;  %v207_v9 = vld [vmem:[#allocation5 + $0x1f0] sm:$0xff]  ;;  %v212_v13 = vld [vmem:[#allocation5 + $0x218] sm:$0xff]  ;;  %v226_v16 = vld [vmem:[#allocation5 + $0x288] sm:$0xff] }
  0x5b   :  { %2605 = vmatprep.subr.bf16.mxu0 %v2604_v55  ;;  %v2646_v11 = vpack.c.bf16 %v213_v10, %v207_v9  ;;  %v220_v14 = vld [vmem:[#allocation5 + $0x258] sm:$0xff]  ;;  %v2612_v15 = vpack.c.bf16 %v212_v13, %v206_v12  ;;  %v205_v17 = vld [vmem:[#allocation5 + $0x1e0] sm:$0xff]  ;;  %v211_v18 = vld [vmem:[#allocation5 + $0x210] sm:$0xff] }
  0x5c   :  { %2639 = vmatpush1.bf16.msra.mxu1 %v2638_v43  ;;  %v2648_v19 = vpack.c.bf16 %v226_v16, %v220_v14  ;;  %v2614_v20 = vpack.c.bf16 %v211_v18, %v205_v17  ;;  %v219_v21 = vld [vmem:[#allocation5 + $0x250] sm:$0xff]  ;;  %v225_v22 = vld [vmem:[#allocation5 + $0x280] sm:$0xff]  ;;  %v218_v24 = vld [vmem:[#allocation5 + $0x248] sm:$0xff] }
  0x5d   :  { %2641 = vmatprep.subr.bf16.mxu1 %v2640_v59  ;;  %v2650_v23 = vpack.c.bf16 %v225_v22, %v219_v21  ;;  %v224_v25 = vld [vmem:[#allocation5 + $0x278] sm:$0xff]  ;;  %v238_v28 = vld [vmem:[#allocation5 + $0x2e8] sm:$0xff]  ;;  %v217_v29 = vld [vmem:[#allocation5 + $0x240] sm:$0xff] }
  0x5e   :  { %2607 = vmatpush1.bf16.msra.mxu0 %v2606_v60  ;;  %v232_v26 = vld [vmem:[#allocation5 + $0x2b8] sm:$0xff]  ;;  %v2616_v27 = vpack.c.bf16 %v224_v25, %v218_v24  ;;  %v223_v30 = vld [vmem:[#allocation5 + $0x270] sm:$0xff]  ;;  %v237_v34 = vld [vmem:[#allocation5 + $0x2e0] sm:$0xff] }
  0x5f   :  { %v2652_v31 = vpack.c.bf16 %v238_v28, %v232_v26  ;;  %v2618_v32 = vpack.c.bf16 %v223_v30, %v217_v29  ;;  %v231_v33 = vld [vmem:[#allocation5 + $0x2b0] sm:$0xff]  ;;  %v230_v36 = vld [vmem:[#allocation5 + $0x2a8] sm:$0xff]  ;;  %v236_v37 = vld [vmem:[#allocation5 + $0x2d8] sm:$0xff] }
  0x60   :  { %2643 = vmatpush1.bf16.msra.mxu1 %v2642_v63  ;;  %v2654_v35 = vpack.c.bf16 %v237_v34, %v231_v33  ;;  %v2620_v38 = vpack.c.bf16 %v236_v37, %v230_v36  ;;  %v229_v39 = vld [vmem:[#allocation5 + $0x2a0] sm:$0xff]  ;;  %v235_v40 = vld [vmem:[#allocation5 + $0x2d0] sm:$0xff]  ;;  %v150_v42 = vld [vmem:[#allocation5 + $0x28] sm:$0xff] }
  0x61   :  { %2645 = vmatprep.subr.bf16.mxu1 %v2644_v7  ;;  %v2622_v41 = vpack.c.bf16 %v235_v40, %v229_v39  ;;  %v156_v43 = vld [vmem:[#allocation5 + $0x58] sm:$0xff]  ;;  %v2215_v55 = vld [vmem:[%s3768_s2] ss:$0 sm:$0xff]  ;;  %v155_v58 = vld [vmem:[#allocation5 + $0x50] sm:$0xff] }
  0x62   :  { %v149_v57 = vld [vmem:[#allocation5 + $0x20] sm:$0xff]  ;;  %v162_v63 = vld [vmem:[#allocation5 + $0x88] sm:$0xff]  ;;  %v167_v4 = vld [vmem:[#allocation5 + $0xb0] sm:$0xff] }
  0x63   :  { %v2216_v59 = vld [vmem:[%s3769_s3] ss:$0 sm:$0xff]  ;;  %v2658_v62 = vpack.c.bf16 %v155_v58, %v149_v57  ;;  %v174_v5 = vld [vmem:[#allocation5 + $0xe8] sm:$0xff]  ;;  %v180_v6 = vld [vmem:[#allocation5 + $0x118] sm:$0xff] }
  0x64   :  { %2647 = vmatpush1.bf16.msra.mxu1 %v2646_v11  ;;  %v173_v10 = vld [vmem:[#allocation5 + $0xe0] sm:$0xff]  ;;  %v179_v11 = vld [vmem:[#allocation5 + $0x110] sm:$0xff]  ;;  %v186_v12 = vld [vmem:[#allocation5 + $0x148] sm:$0xff] }
  0x65   :  { %2649 = vmatprep.subr.bf16.mxu1 %v2648_v19  ;;  %v192_v13 = vld [vmem:[#allocation5 + $0x178] sm:$0xff]  ;;  %v2666_v14 = vpack.c.bf16 %v179_v11, %v173_v10  ;;  %v185_v16 = vld [vmem:[#allocation5 + $0x140] sm:$0xff]  ;;  %v191_v17 = vld [vmem:[#allocation5 + $0x170] sm:$0xff] }
  0x66   :  { %v198_v18 = vld [vmem:[#allocation5 + $0x1a8] sm:$0xff]  ;;  %v204_v19 = vld [vmem:[#allocation5 + $0x1d8] sm:$0xff]  ;;  %v197_v22 = vld [vmem:[#allocation5 + $0x1a0] sm:$0xff] }
  0x67   :  { %v2672_v21 = vpack.c.bf16 %v204_v19, %v198_v18  ;;  %v210_v24 = vld [vmem:[#allocation5 + $0x208] sm:$0xff]  ;;  %v216_v25 = vld [vmem:[#allocation5 + $0x238] sm:$0xff]  ;;  %v209_v28 = vld [vmem:[#allocation5 + $0x200] sm:$0xff] }
  0x68   :  { %2651 = vmatpush1.bf16.msra.mxu1 %v2650_v23  ;;  %v203_v23 = vld [vmem:[#allocation5 + $0x1d0] sm:$0xff]  ;;  %v222_v30 = vld [vmem:[#allocation5 + $0x268] sm:$0xff]  ;;  %v221_v34 = vld [vmem:[#allocation5 + $0x260] sm:$0xff] }
  0x69   :  { %2653 = vmatprep.subr.bf16.mxu1 %v2652_v31  ;;  %v2674_v26 = vpack.c.bf16 %v203_v23, %v197_v22  ;;  %v215_v29 = vld [vmem:[#allocation5 + $0x230] sm:$0xff]  ;;  %v228_v31 = vld [vmem:[#allocation5 + $0x298] sm:$0xff]  ;;  %v234_v36 = vld [vmem:[#allocation5 + $0x2c8] sm:$0xff] }
  0x6a   :  { %v2680_v33 = vpack.c.bf16 %v228_v31, %v222_v30  ;;  %v240_v37 = vld [vmem:[#allocation5 + $0x2f8] sm:$0xff]  ;;  %v233_v40 = vld [vmem:[#allocation5 + $0x2c0] sm:$0xff]  ;;  %v826_v58 = vld [vmem:[#allocation8 + $0x1a8] sm:$0xff] }
  0x6b   :  { %v2684_v39 = vpack.c.bf16 %v240_v37, %v234_v36  ;;  %v825_v57 = vld [vmem:[#allocation8 + $0x1a0] sm:$0xff]  ;;  %v814_v10 = vld [vmem:[#allocation8 + $0x148] sm:$0xff]  ;;  %v831_v11 = vld [vmem:[#allocation8 + $0x1d0] sm:$0xff] }
  0x6c   :  { %2655 = vmatpush1.bf16.msra.mxu1 %v2654_v35  ;;  %v227_v35 = vld [vmem:[#allocation5 + $0x290] sm:$0xff]  ;;  %v834_v18 = vld [vmem:[#allocation8 + $0x1e8] sm:$0xff] }
  0x6d   :  { %v818_v22 = vld [vmem:[#allocation8 + $0x168] sm:$0xff]  ;;  %v835_v23 = vld [vmem:[#allocation8 + $0x1f0] sm:$0xff] }
  0xd9   :  { %v105_v44 = vpop.xlane.xlu0 %104 }
  0xda   :  { %v109_v45 = vmul.f32 0.0078125, %v105_v44  ;;  %v2656_v44 = vpack.c.bf16 %v156_v43, %v150_v42  ;;  %v821_v42 = vld [vmem:[#allocation8 + $0x180] sm:$0xff]  ;;  %v822_v43 = vld [vmem:[#allocation8 + $0x188] sm:$0xff] }
  0xdc   :  { %v3339_v46 = vsub.f32 %v100_v0, %v109_v45  ;;  %v194_v0 = vld [vmem:[#allocation5 + $0x188] sm:$0xff]  ;;  %v3780_v45 = vmov 0.0  }
  0xdd   :  { %v107_v47 = vpop.xlane.xlu0 %106  ;;  %305 = vmatprep.mubr.f32.mxu0 %v3780_v45  ;;  %382 = vmatprep.mubr.f32.mxu1 %v3780_v45 }
  0xde   :  { %v110_v48 = vmul.f32 0.0078125, %v107_v47  ;;  %v113_v49 = vmul.f32 %v3339_v46, %v3339_v46 }
  0xe0   :  { %v3344_v50 = vsub.f32 %v3336_v1, %v110_v48  ;;  %115 = vadd.xlane.f32.xlu1 %v113_v49  ;;  %v200_v1 = vld [vmem:[#allocation5 + $0x1b8] sm:$0xff] }
  0xe1   :  { %v2608_v3 = vpack.c.bf16 %v200_v1, %v194_v0  ;;  %v168_v0 = vld [vmem:[#allocation5 + $0xb8] sm:$0xff] }
  0xe2   :  { %v114_v51 = vmul.f32 %v3344_v50, %v3344_v50  ;;  %v2660_v7 = vpack.c.bf16 %v168_v0, %v162_v63  ;;  %v827_v63 = vld [vmem:[#allocation8 + $0x1b0] sm:$0xff]  ;;  %v828_v0 = vld [vmem:[#allocation8 + $0x1b8] sm:$0xff] }
  0xe3   :  { %2609 = vmatprep.subr.bf16.mxu0 %v2608_v3  ;;  %v161_v3 = vld [vmem:[#allocation5 + $0x80] sm:$0xff] }
  0xe4   :  { %117 = vadd.xlane.f32.xlu1 %v114_v51  ;;  %2611 = vmatpush1.bf16.msra.mxu0 %v2610_v8  ;;  %v2662_v8 = vpack.c.bf16 %v167_v4, %v161_v3  ;;  %v3392_v3 = vpack.c.bf16 %v828_v0, %v827_v63  ;;  %v811_v4 = vld [vmem:[#allocation8 + $0x130] sm:$0xff] }
  0xe5   :  { %2613 = vmatprep.subr.bf16.mxu0 %v2612_v15  ;;  %v2668_v15 = vpack.c.bf16 %v192_v13, %v186_v12  ;;  %v832_v12 = vld [vmem:[#allocation8 + $0x1d8] sm:$0xff] }
  0xe8   :  { %2615 = vmatpush1.bf16.msra.mxu0 %v2614_v20  ;;  %v2670_v20 = vpack.c.bf16 %v191_v17, %v185_v16  ;;  %v816_v16 = vld [vmem:[#allocation8 + $0x158] sm:$0xff]  ;;  %v833_v17 = vld [vmem:[#allocation8 + $0x1e0] sm:$0xff] }
  0xe9   :  { %2617 = vmatprep.subr.bf16.mxu0 %v2616_v27  ;;  %v2676_v27 = vpack.c.bf16 %v216_v25, %v210_v24  ;;  %v836_v24 = vld [vmem:[#allocation8 + $0x1f8] sm:$0xff] }
  0xec   :  { %2619 = vmatpush1.bf16.msra.mxu0 %v2618_v32  ;;  %v2678_v32 = vpack.c.bf16 %v215_v29, %v209_v28  ;;  %v820_v28 = vld [vmem:[#allocation8 + $0x178] sm:$0xff] }
  0xed   :  { %2621 = vmatprep.subr.bf16.mxu0 %v2620_v38  ;;  %v2682_v38 = vpack.c.bf16 %v227_v35, %v221_v34 }
  0xf0   :  { %2623 = vmatpush1.bf16.msra.mxu0 %v2622_v41  ;;  %v239_v41 = vld [vmem:[#allocation5 + $0x2f0] sm:$0xff] }
  0xf1   :  { %2657 = vmatprep.subr.bf16.mxu0 %v2656_v44  ;;  %v2686_v44 = vpack.c.bf16 %v239_v41, %v233_v40 }
 0x16d   :  { %v116_v47 = vpop.xlane.xlu1 %115 }
 0x16e   :  { %v119_v48 = vmul.f32 0.0078125, %v116_v47  ;;  %v3372_v47 = vpack.c.bf16 %v822_v43, %v821_v42  ;;  %v3445_v42 = vld [vmem:[%s3767_s1] sm:$0xff] }
 0x170   :  { %v121_v49 = vadd.f32 1e-05, %v119_v48  ;;  %v805_v48 = vld [vmem:[#allocation8 + $0x100] sm:$0xff] }
 0x171   :  { %v118_v51 = vpop.xlane.xlu1 %117 }
 0x172   :  { %3020 = vrsqrt.f32 %v121_v49  ;;  %v120_v52 = vmul.f32 0.0078125, %v118_v51  ;;  %v806_v49 = vld [vmem:[#allocation8 + $0x108] sm:$0xff]  ;;  %v823_v51 = vld [vmem:[#allocation8 + $0x190] sm:$0xff] }
 0x174   :  { %v122_v53 = vadd.f32 1e-05, %v120_v52  ;;  %v824_v52 = vld [vmem:[#allocation8 + $0x198] sm:$0xff] }
 0x176   :  { %3022 = vrsqrt.f32 %v122_v53  ;;  %v3374_v53 = vpack.c.bf16 %v806_v49, %v805_v48 }
 0x17c   :  { %v3021_v54 = vpop.eup %3020 }
 0x17d   :  { %v125_v56 = vmul.f32 %v3021_v54, %v3339_v46  ;;  %v3377_v54 = vpack.c.bf16 %v824_v52, %v823_v51  ;;  %v3452_v51 = vld [vmem:[%s3767_s1 + $0x18] sm:$0xff] }
 0x17f   :  { %v133_v60 = vmul.f32 %v2215_v55, %v125_v56  ;;  %v808_v56 = vld [vmem:[#allocation8 + $0x118] sm:$0xff] }
 0x180   :  { %v3023_v61 = vpop.eup %3022 }
 0x181   :  { %v3357_v1 = vadd.f32 %v2216_v59, %v133_v60  ;;  %v126_v2 = vmul.f32 %v3023_v61, %v3344_v50  ;;  %v2664_v50 = vpack.c.bf16 %v180_v6, %v174_v5  ;;  %v3385_v60 = vpack.c.bf16 %v826_v58, %v825_v57  ;;  %v809_v61 = vld [vmem:[#allocation8 + $0x120] sm:$0xff]  ;;  %v812_v5 = vld [vmem:[#allocation8 + $0x138] sm:$0xff] }
 0x182   :  { %v829_v6 = vld [vmem:[#allocation8 + $0x1c0] sm:$0xff] }
 0x183   :  { %v134_v46 = vmul.f32 %v2215_v55, %v126_v2  ;;  %306 = vmatmul.mubr.f32.vlgmr.msra.gmra.mrb[0].mxu0 %v3357_v1  ;;  %383 = vmatmul.mubr.f32.vlgmr.msra.gmra.mrb[0].mxu1 %v3357_v1  ;;  %v807_v55 = vld [vmem:[#allocation8 + $0x110] sm:$0xff] }
 0x184   :  { %2659 = vmatpush1.bf16.msra.mxu0 %v2658_v62  ;;  %2548 = vmatprep.subr.mxu1 %v3357_v1  ;;  %v810_v62 = vld [vmem:[#allocation8 + $0x128] sm:$0xff] }
 0x185   :  { %v3363_v9 = vadd.f32 %v2216_v59, %v134_v46  ;;  %2549 = vmatpush3.xpose.msra.mxu1 %v3357_v1  ;;  %311 = vmatprep.mubr.f32.mxu0 %v3780_v45  ;;  %v3382_v59 = vpack.c.bf16 %v808_v56, %v807_v55  ;;  %v3389_v2 = vpack.c.bf16 %v810_v62, %v809_v61  ;;  %v830_v46 = vld [vmem:[#allocation8 + $0x1c8] sm:$0xff]  ;;  %v3458_v55 = vld [vmem:[%s3767_s1 + $0x10] sm:$0xff] }
 0x186   :  { %2559 = vmatprep.subr.mxu1 %v3357_v1  ;;  %388 = vmatprep.mubr.f32.mxu1 %v3780_v45 }
 0x187   :  { %2661 = vmatprep.subr.bf16.mxu0 %v2660_v7  ;;  %312 = vmatmul.mubr.f32.gmra.mrb[2].mxu0 %v3363_v9  ;;  %v3395_v7 = vpack.c.bf16 %v812_v5, %v811_v4  ;;  %v3468_v4 = vld [vmem:[%s3767_s1 + $0x28] sm:$0xff]  ;;  %v3473_v5 = vld [vmem:[%s3767_s1 + $0x20] sm:$0xff] }
 0x188   :  { %389 = vmatmul.mubr.f32.gmra.mrb[2].mxu1 %v3363_v9  ;;  %2663 = vmatpush1.bf16.msra.mxu0 %v2662_v8  ;;  %v3398_v8 = vpack.c.bf16 %v830_v46, %v829_v6 }
 0x189   :  { %2665 = vmatprep.subr.bf16.mxu0 %v2664_v50  ;;  %459 = vmatprep.mubr.f32.mxu0 %v3780_v45  ;;  %v813_v50 = vld [vmem:[#allocation8 + $0x140] sm:$0xff] }
 0x18a   :  { %v3401_v13 = vpack.c.bf16 %v814_v10, %v813_v50 }
 0x18c   :  { %2667 = vmatpush1.bf16.msra.mxu0 %v2666_v14  ;;  %v3404_v14 = vpack.c.bf16 %v832_v12, %v831_v11 }
 0x18d   :  { %2669 = vmatprep.subr.bf16.mxu0 %v2668_v15  ;;  %v815_v15 = vld [vmem:[#allocation8 + $0x150] sm:$0xff] }
 0x18e   :  { %v3407_v19 = vpack.c.bf16 %v816_v16, %v815_v15 }
 0x190   :  { %2671 = vmatpush1.bf16.msra.mxu0 %v2670_v20  ;;  %v3410_v20 = vpack.c.bf16 %v834_v18, %v833_v17 }
 0x191   :  { %2673 = vmatprep.subr.bf16.mxu0 %v2672_v21  ;;  %v817_v21 = vld [vmem:[#allocation8 + $0x160] sm:$0xff] }
 0x192   :  { %v3413_v25 = vpack.c.bf16 %v818_v22, %v817_v21 }
 0x194   :  { %2675 = vmatpush1.bf16.msra.mxu0 %v2674_v26  ;;  %v3416_v26 = vpack.c.bf16 %v836_v24, %v835_v23 }
 0x195   :  { %2677 = vmatprep.subr.bf16.mxu0 %v2676_v27  ;;  %v819_v27 = vld [vmem:[#allocation8 + $0x170] sm:$0xff] }
 0x196   :  { %v3419_v29 = vpack.c.bf16 %v820_v28, %v819_v27 }
 0x198   :  { %2679 = vmatpush1.bf16.msra.mxu0 %v2678_v32 }
 0x199   :  { %2681 = vmatprep.subr.bf16.mxu0 %v2680_v33 }
 0x19c   :  { %2683 = vmatpush1.bf16.msra.mxu0 %v2682_v38 }
 0x19d   :  { %2685 = vmatprep.subr.bf16.mxu0 %v2684_v39 }
 0x1a0   :  { %2687 = vmatpush1.bf16.msra.mxu0 %v2686_v44 }
 0x1a1   :  { %2721 = vmatprep.subr.bf16.mxu0 %v3372_v47 }
 0x1a3   :  { %460 = vmatmul.mubr.f32.vlgmr.msra.gmra.mrb[4].mxu0 %v3357_v1 }
 0x1a4   :  { %2723 = vmatpush3.bf16.msra.mxu0 %v3374_v53  ;;  %465 = vmatprep.mubr.f32.mxu0 %v3780_v45  ;;  %v864_v45 = vld [vmem:[#allocation8 + $0x2d8] sm:$0xff] }
 0x1a5   :  { %2725 = vmatprep.subr.bf16.mxu0 %v3377_v54 }
 0x1a7   :  { %466 = vmatmul.mubr.f32.gmra.mrb[6].mxu0 %v3363_v9 }
 0x1a8   :  { %2727 = vmatpush3.bf16.msra.mxu0 %v3382_v59 }
 0x1a9   :  { %2729 = vmatprep.subr.bf16.mxu0 %v3385_v60 }
 0x1ac   :  { %2731 = vmatpush3.bf16.msra.mxu0 %v3389_v2 }
 0x1ad   :  { %2733 = vmatprep.subr.bf16.mxu0 %v3392_v3 }
 0x1b0   :  { %2735 = vmatpush3.bf16.msra.mxu0 %v3395_v7 }
 0x1b1   :  { %2737 = vmatprep.subr.bf16.mxu0 %v3398_v8 }
 0x1b4   :  { %2739 = vmatpush3.bf16.msra.mxu0 %v3401_v13 }
 0x1b5   :  { %2741 = vmatprep.subr.bf16.mxu0 %v3404_v14 }
 0x1b8   :  { %2743 = vmatpush3.bf16.msra.mxu0 %v3407_v19 }
 0x1b9   :  { %2745 = vmatprep.subr.bf16.mxu0 %v3410_v20 }
 0x1bc   :  { %2747 = vmatpush3.bf16.msra.mxu0 %v3413_v25 }
 0x1bd   :  { %2749 = vmatprep.subr.bf16.mxu0 %v3416_v26 }
 0x1c0   :  { %2751 = vmatpush3.bf16.msra.mxu0 %v3419_v29 }
 0x1c1   :  { %2581 = vmatprep.subr.mxu0 %v3363_v9 }
 0x256   :  { %v307_v30 = vpop.f32.mrb[0].mxu0  ;;  %v384_v31 = vpop.f32.mrb[0].mxu1 }
 0x257   :  { %v309_v32 = vpop.f32.mrb[1].mxu0  ;;  %v386_v33 = vpop.f32.mrb[1].mxu1  ;;  %2550 = vmatprep.mubr.f32.mxu1 %v307_v30 }
 0x258   :  { %2551 = vmatmul.mubr.f32.vlgmr.msra.gmra.mrb[4].mxu1 %v309_v32 }
 0x259   :  { %2560 = vmatpush3.msra.mxu1 %v3357_v1  ;;  %2553 = vmatprep.mubr.f32.mxu1 %v384_v31  ;;  %v3440_v1 = vld [vmem:[%s3767_s1 + $0x8] sm:$0xff] }
 0x25a   :  { %v3425_v34 = vpop.f32.mrb[2].mxu0 }
 0x25b   :  { %v3427_v35 = vpop.f32.mrb[2].mxu1  ;;  %v3429_v36 = vpop.f32.mrb[3].mxu0 }
 0x25c   :  { %v3431_v37 = vpop.f32.mrb[3].mxu1  ;;  %2554 = vmatmul.mubr.f32.gmra.mrb[6].mxu1 %v386_v33 }
 0x276   :  { %v461_v38 = vpop.f32.mrb[4].mxu0 }
 0x277   :  { %v463_v39 = vpop.f32.mrb[5].mxu0  ;;  %2556 = vmatprep.mubr.f32.mxu1 %v461_v38 }
 0x278   :  { %2557 = vmatmul.mubr.f32.gmra.mrb[8].mxu1 %v463_v39 }
 0x27a   :  { %v3433_v40 = vpop.f32.mrb[6].mxu0 }
 0x27b   :  { %v3435_v41 = vpop.f32.mrb[7].mxu0 }
 0x32b   :  { %v2552_v43 = vpop.f32.mrb[4].mxu1 }
 0x32c   :  { %v570_v44 = vadd.f32 %v2552_v43, %v3440_v1  ;;  %v564_v48 = vpop.f32.mrb[5].mxu1 }
 0x32d   :  { %v565_v49 = vadd.f32 %v564_v48, %v3445_v42 }
 0x32e   :  { %v597_v52 = vsel %vm593_vm0, %v570_v44, -inf }
 0x32f   :  { %598 = vmax.xlane.f32.xlu1 %v597_v52  ;;  %v2555_v56 = vpop.f32.mrb[6].mxu1  ;;  %v594_v57 = vsel %vm593_vm0, %v565_v49, -inf }
 0x330   :  { %v580_v58 = vadd.f32 %v2555_v56, %v3452_v51  ;;  %v574_v61 = vpop.f32.mrb[7].mxu1  ;;  %595 = vmax.xlane.f32.xlu0 %v594_v57 }
 0x331   :  { %v575_v62 = vadd.f32 %v574_v61, %v3458_v55 }
 0x332   :  { %v603_v63 = vsel %vm593_vm0, %v580_v58, -inf }
 0x333   :  { %604 = vmax.xlane.f32.xlu1 %v603_v63  ;;  %v600_v0 = vsel %vm593_vm0, %v575_v62, -inf }
 0x334   :  { %601 = vmax.xlane.f32.xlu0 %v600_v0 }
 0x34b   :  { %v2558_v6 = vpop.f32.mrb[8].mxu1 }
 0x34c   :  { %v590_v46 = vadd.f32 %v2558_v6, %v3468_v4  ;;  %v584_v50 = vpop.f32.mrb[9].mxu1 }
 0x34d   :  { %v585_v10 = vadd.f32 %v584_v50, %v3473_v5 }
 0x34e   :  { %v609_v11 = vsel %vm593_vm0, %v590_v46, -inf }
 0x34f   :  { %610 = vmax.xlane.f32.xlu1 %v609_v11  ;;  %v606_v12 = vsel %vm593_vm0, %v585_v10, -inf  ;;  %v789_v11 = vld [vmem:[#allocation8 + $0x80] sm:$0xff] }
 0x350   :  { %607 = vmax.xlane.f32.xlu0 %v606_v12 }
 0x3bc   :  { %v599_v15 = vpop.xlane.xlu1 %598 }
 0x3bd   :  { %v613_v16 = vsub.f32 %v570_v44, %v599_v15  ;;  %v596_v17 = vpop.xlane.xlu0 %595 }
 0x3be   :  { %v612_v18 = vsub.f32 %v565_v49, %v596_v17 }
 0x3bf   :  { %v620_v21 = vmul.f32 1.442695, %v613_v16 }
 0x3c0   :  { %v618_v22 = vmul.f32 1.442695, %v612_v18  ;;  %v605_v23 = vpop.xlane.xlu1 %604  ;;  %v773_v18 = vld [vmem:[#allocation8] sm:$0xff] }
 0x3c1   :  { %3024 = vpow2.f32 %v620_v21  ;;  %v615_v24 = vsub.f32 %v580_v58, %v605_v23  ;;  %v602_v27 = vpop.xlane.xlu0 %601  ;;  %v774_v21 = vld [vmem:[#allocation8 + $0x8] sm:$0xff]  ;;  %v791_v23 = vld [vmem:[#allocation8 + $0x90] sm:$0xff] }
 0x3c2   :  { %3026 = vpow2.f32 %v618_v22  ;;  %v614_v28 = vsub.f32 %v575_v62, %v602_v27 }
 0x3c3   :  { %v624_v30 = vmul.f32 1.442695, %v615_v24  ;;  %v792_v24 = vld [vmem:[#allocation8 + $0x98] sm:$0xff] }
 0x3c4   :  { %v622_v31 = vmul.f32 1.442695, %v614_v28 }
 0x3c5   :  { %3028 = vpow2.f32 %v624_v30  ;;  %v3494_v30 = vpack.c.bf16 %v774_v21, %v773_v18  ;;  %v781_v21 = vld [vmem:[#allocation8 + $0x40] sm:$0xff] }
 0x3c6   :  { %3030 = vpow2.f32 %v622_v31 }
 0x3cb   :  { %v3025_v32 = vpop.eup %3024 }
 0x3cc   :  { %v3027_v33 = vpop.eup %3026  ;;  %v633_v38 = vsel %vm593_vm0, %v3025_v32, 0.0 }
 0x3cd   :  { %634 = vadd.xlane.f32.xlu1 %v633_v38  ;;  %v630_v39 = vsel %vm593_vm0, %v3027_v33, 0.0  ;;  %v3496_v38 = vpack.c.bf16 %v792_v24, %v791_v23  ;;  %v799_v23 = vld [vmem:[#allocation8 + $0xd0] sm:$0xff]  ;;  %v800_v24 = vld [vmem:[#allocation8 + $0xd8] sm:$0xff] }
 0x3ce   :  { %631 = vadd.xlane.f32.xlu0 %v630_v39  ;;  %v775_v39 = vld [vmem:[#allocation8 + $0x10] sm:$0xff] }
 0x3cf   :  { %v3029_v43 = vpop.eup %3028 }
 0x3d0   :  { %v3031_v44 = vpop.eup %3030  ;;  %v639_v48 = vsel %vm593_vm0, %v3029_v43, 0.0 }
 0x3d1   :  { %640 = vadd.xlane.f32.xlu1 %v639_v48  ;;  %v636_v49 = vsel %vm593_vm0, %v3031_v44, 0.0  ;;  %v776_v48 = vld [vmem:[#allocation8 + $0x18] sm:$0xff] }
 0x3d2   :  { %637 = vadd.xlane.f32.xlu0 %v636_v49 }
 0x3dc   :  { %v611_v52 = vpop.xlane.xlu1 %610 }
 0x3dd   :  { %v617_v56 = vsub.f32 %v590_v46, %v611_v52  ;;  %v608_v57 = vpop.xlane.xlu0 %607  ;;  %v790_v46 = vld [vmem:[#allocation8 + $0x88] sm:$0xff]  ;;  %v793_v52 = vld [vmem:[#allocation8 + $0xa0] sm:$0xff] }
 0x3de   :  { %v616_v58 = vsub.f32 %v585_v10, %v608_v57  ;;  %v3491_v12 = vpack.c.bf16 %v790_v46, %v789_v11  ;;  %v796_v11 = vld [vmem:[#allocation8 + $0xb8] sm:$0xff] }
 0x3df   :  { %v628_v61 = vmul.f32 1.442695, %v617_v56  ;;  %v794_v56 = vld [vmem:[#allocation8 + $0xa8] sm:$0xff] }
 0x3e0   :  { %v626_v62 = vmul.f32 1.442695, %v616_v58  ;;  %2689 = vmatprep.subr.bf16.mxu1 %v3491_v12 }
 0x3e1   :  { %3032 = vpow2.f32 %v628_v61  ;;  %v3501_v61 = vpack.c.bf16 %v776_v48, %v775_v39  ;;  %v784_v39 = vld [vmem:[#allocation8 + $0x58] sm:$0xff]  ;;  %v801_v48 = vld [vmem:[#allocation8 + $0xe0] sm:$0xff] }
 0x3e2   :  { %3034 = vpow2.f32 %v626_v62  ;;  %v777_v62 = vld [vmem:[#allocation8 + $0x20] sm:$0xff] }
 0x3eb   :  { %v3483_v63 = vpop.eup %3032 }
 0x3ec   :  { %v3485_v0 = vpop.eup %3034  ;;  %v645_v6 = vsel %vm593_vm0, %v3483_v63, 0.0 }
 0x3ed   :  { %646 = vadd.xlane.f32.xlu1 %v645_v6  ;;  %v642_v50 = vsel %vm593_vm0, %v3485_v0, 0.0  ;;  %v778_v6 = vld [vmem:[#allocation8 + $0x28] sm:$0xff] }
 0x3ee   :  { %643 = vadd.xlane.f32.xlu0 %v642_v50  ;;  %v795_v50 = vld [vmem:[#allocation8 + $0xb0] sm:$0xff] }
 0x3ef   :  { %v3512_v46 = vpack.c.bf16 %v796_v11, %v795_v50  ;;  %v804_v50 = vld [vmem:[#allocation8 + $0xf8] sm:$0xff] }
 0x45a   :  { %v635_v10 = vpop.xlane.xlu1 %634 }
 0x45b   :  { %3036 = vrcp.f32 %v635_v10  ;;  %v632_v15 = vpop.xlane.xlu0 %631  ;;  %v780_v10 = vld [vmem:[#allocation8 + $0x38] sm:$0xff] }
 0x45c   :  { %3038 = vrcp.f32 %v632_v15  ;;  %v797_v15 = vld [vmem:[#allocation8 + $0xc0] sm:$0xff] }
 0x45e   :  { %v641_v16 = vpop.xlane.xlu1 %640 }
 0x45f   :  { %3040 = vrcp.f32 %v641_v16  ;;  %v638_v17 = vpop.xlane.xlu0 %637  ;;  %v798_v16 = vld [vmem:[#allocation8 + $0xc8] sm:$0xff] }
 0x460   :  { %3042 = vrcp.f32 %v638_v17  ;;  %v3518_v18 = vpack.c.bf16 %v798_v16, %v797_v15  ;;  %v788_v15 = vld [vmem:[#allocation8 + $0x78] sm:$0xff] }
 0x465   :  { %v3037_v22 = vpop.eup %3036 }
 0x466   :  { %v3039_v27 = vpop.eup %3038  ;;  %v651_v31 = vmul.f32 %v3037_v22, %v3025_v32  ;;  %v3504_v32 = vpack.c.bf16 %v794_v56, %v793_v52  ;;  %v782_v22 = vld [vmem:[#allocation8 + $0x48] sm:$0xff] }
 0x467   :  { %v649_v28 = vmul.f32 %v3039_v27, %v3027_v33  ;;  %v3521_v27 = vpack.c.bf16 %v782_v22, %v781_v21 }
 0x469   :  { %v3041_v49 = vpop.eup %3040  ;;  %2561 = vmatprep.mubr.msk.f32.mxu1 %vm593_vm0, %v649_v28  ;;  %v3524_v28 = vpack.c.bf16 %v800_v24, %v799_v23 }
 0x46a   :  { %v3043_v57 = vpop.eup %3042  ;;  %2562 = vmatmul.mubr.msk.f32.vlgmr.msra.gmra.mrb[10].mxu1 %vm593_vm0, %v651_v31  ;;  %v655_v33 = vmul.f32 %v3041_v49, %v3029_v43  ;;  %v779_v43 = vld [vmem:[#allocation8 + $0x30] sm:$0xff]  ;;  %v802_v49 = vld [vmem:[#allocation8 + $0xe8] sm:$0xff] }
 0x46b   :  { %v653_v58 = vmul.f32 %v3043_v57, %v3031_v44  ;;  %2691 = vmatpush3.bf16.msra.mxu1 %v3494_v30  ;;  %v3509_v44 = vpack.c.bf16 %v778_v6, %v777_v62  ;;  %v3515_v17 = vpack.c.bf16 %v780_v10, %v779_v43  ;;  %v783_v31 = vld [vmem:[#allocation8 + $0x50] sm:$0xff]  ;;  %v786_v62 = vld [vmem:[#allocation8 + $0x68] sm:$0xff] }
 0x46c   :  { %2693 = vmatprep.subr.bf16.mxu1 %v3496_v38  ;;  %v3527_v57 = vpack.c.bf16 %v784_v39, %v783_v31  ;;  %v803_v6 = vld [vmem:[#allocation8 + $0xf0] sm:$0xff]  ;;  %v853_v31 = vld [vmem:[#allocation8 + $0x280] sm:$0xff]  ;;  %v854_v39 = vld [vmem:[#allocation8 + $0x288] sm:$0xff] }
 0x46d   :  { %2564 = vmatprep.mubr.msk.f32.mxu1 %vm593_vm0, %v653_v58  ;;  %v3530_v58 = vpack.c.bf16 %v802_v49, %v801_v48  ;;  %v3536_v43 = vpack.c.bf16 %v804_v50, %v803_v6  ;;  %v787_v10 = vld [vmem:[#allocation8 + $0x70] sm:$0xff]  ;;  %v3547_v48 = vpack.c.bf16 %v854_v39, %v853_v31  ;;  %v837_v49 = vld [vmem:[#allocation8 + $0x200] sm:$0xff]  ;;  %v840_v50 = vld [vmem:[#allocation8 + $0x218] sm:$0xff] }
 0x46e   :  { %2565 = vmatmul.mubr.msk.f32.gmra.mrb[12].mxu1 %vm593_vm0, %v655_v33  ;;  %v785_v33 = vld [vmem:[#allocation8 + $0x60] sm:$0xff]  ;;  %v3539_v16 = vpack.c.bf16 %v788_v15, %v787_v10  ;;  %v842_v39 = vld [vmem:[#allocation8 + $0x228] sm:$0xff] }
 0x46f   :  { %2695 = vmatpush3.bf16.msra.mxu1 %v3501_v61  ;;  %v3533_v11 = vpack.c.bf16 %v786_v62, %v785_v33  ;;  %v856_v33 = vld [vmem:[#allocation8 + $0x298] sm:$0xff]  ;;  %v857_v15 = vld [vmem:[#allocation8 + $0x2a0] sm:$0xff] }
 0x470   :  { %2697 = vmatprep.subr.bf16.mxu1 %v3504_v32  ;;  %v841_v31 = vld [vmem:[#allocation8 + $0x220] sm:$0xff] }
 0x473   :  { %2699 = vmatpush3.bf16.msra.mxu1 %v3509_v44 }
 0x474   :  { %2701 = vmatprep.subr.bf16.mxu1 %v3512_v46 }
 0x477   :  { %2703 = vmatpush3.bf16.msra.mxu1 %v3515_v17 }
 0x478   :  { %2705 = vmatprep.subr.bf16.mxu1 %v3518_v18 }
 0x47a   :  { %v647_v52 = vpop.xlane.xlu1 %646 }
 0x47b   :  { %3044 = vrcp.f32 %v647_v52  ;;  %v644_v56 = vpop.xlane.xlu0 %643  ;;  %2707 = vmatpush3.bf16.msra.mxu1 %v3521_v27  ;;  %v838_v52 = vld [vmem:[#allocation8 + $0x208] sm:$0xff] }
 0x47c   :  { %3046 = vrcp.f32 %v644_v56  ;;  %2709 = vmatprep.subr.bf16.mxu1 %v3524_v28  ;;  %v855_v56 = vld [vmem:[#allocation8 + $0x290] sm:$0xff]  ;;  %v3550_v62 = vpack.c.bf16 %v838_v52, %v837_v49 }
 0x47d   :  { %v3552_v6 = vpack.c.bf16 %v856_v33, %v855_v56  ;;  %v859_v52 = vld [vmem:[#allocation8 + $0x2b0] sm:$0xff]  ;;  %v860_v56 = vld [vmem:[#allocation8 + $0x2b8] sm:$0xff]  ;;  %v3562_v33 = vpack.c.bf16 %v842_v39, %v841_v31  ;;  %v845_v31 = vld [vmem:[#allocation8 + $0x240] sm:$0xff] }
 0x47e   :  { %v846_v39 = vld [vmem:[#allocation8 + $0x248] sm:$0xff] }
 0x47f   :  { %2711 = vmatpush3.bf16.msra.mxu1 %v3527_v57  ;;  %3787 = vst [vmem:[#allocation18_spill] sm:$0xff] %v3562_v33 }
 0x480   :  { %2713 = vmatprep.subr.bf16.mxu1 %v3530_v58 }
 0x483   :  { %2715 = vmatpush3.bf16.msra.mxu1 %v3533_v11 }
 0x484   :  { %2717 = vmatprep.subr.bf16.mxu1 %v3536_v43 }
 0x485   :  { %v3045_v21 = vpop.eup %3044 }
 0x486   :  { %v3047_v22 = vpop.eup %3046  ;;  %v659_v24 = vmul.f32 %v3045_v21, %v3483_v63  ;;  %v839_v63 = vld [vmem:[#allocation8 + $0x210] sm:$0xff]  ;;  %v858_v21 = vld [vmem:[#allocation8 + $0x2a8] sm:$0xff] }
 0x487   :  { %v657_v23 = vmul.f32 %v3047_v22, %v3485_v0  ;;  %2719 = vmatpush3.bf16.msra.mxu1 %v3539_v16  ;;  %v3555_v22 = vpack.c.bf16 %v840_v50, %v839_v63  ;;  %v843_v63 = vld [vmem:[#allocation8 + $0x230] sm:$0xff]  ;;  %v844_v50 = vld [vmem:[#allocation8 + $0x238] sm:$0xff] }
 0x488   :  { %2753 = vmatprep.subr.bf16.mxu1 %v3547_v48 }
 0x489   :  { %2567 = vmatprep.mubr.msk.f32.mxu1 %vm593_vm0, %v657_v23 }
 0x48a   :  { %2568 = vmatmul.mubr.msk.f32.gmra.mrb[14].mxu1 %vm593_vm0, %v659_v24  ;;  %v3558_v24 = vpack.c.bf16 %v858_v21, %v857_v15  ;;  %v862_v15 = vld [vmem:[#allocation8 + $0x2c8] sm:$0xff]  ;;  %v3569_v21 = vpack.c.bf16 %v844_v50, %v843_v63  ;;  %v865_v63 = vld [vmem:[#allocation8 + $0x2e0] sm:$0xff] }
 0x48b   :  { %v866_v50 = vld [vmem:[#allocation8 + $0x2e8] sm:$0xff] }
 0x48c   :  { %3789 = vst [vmem:[#allocation20_spill] sm:$0xff] %v3569_v21 }
 0x53d   :  { %v2563_v0 = vpop.f32.mrb[10].mxu1 }
 0x53e   :  { %v744_v10 = vpop.f32.mrb[11].mxu1  ;;  %933 = vmatprep.mubr.f32.mxu1 %v2563_v0  ;;  %v3565_v0 = vpack.c.bf16 %v860_v56, %v859_v52  ;;  %v3575_v52 = vpack.c.bf16 %v846_v39, %v845_v31  ;;  %v847_v56 = vld [vmem:[#allocation8 + $0x250] sm:$0xff]  ;;  %v868_v39 = vld [vmem:[#allocation8 + $0x2f8] sm:$0xff] }
 0x53f   :  { %934 = vmatmul.mubr.f32.vlgmr.msra.gmra.mrb[16].mxu1 %v744_v10  ;;  %v861_v10 = vld [vmem:[#allocation8 + $0x2c0] sm:$0xff]  ;;  %v867_v31 = vld [vmem:[#allocation8 + $0x2f0] sm:$0xff] }
 0x540   :  { %2755 = vmatpush3.bf16.msra.mxu1 %v3550_v62  ;;  %3788 = vst [vmem:[#allocation19_spill] sm:$0xff] %v3565_v0  ;;  %3791 = vst [vmem:[#allocation22_spill] sm:$0xff] %v3575_v52 }
 0x541   :  { %v2566_v23 = vpop.f32.mrb[12].mxu1  ;;  %2757 = vmatprep.subr.bf16.mxu1 %v3552_v6 }
 0x542   :  { %v754_v49 = vpop.f32.mrb[13].mxu1  ;;  %1003 = vmatprep.mubr.f32.mxu0 %v2566_v23  ;;  %v3572_v23 = vpack.c.bf16 %v862_v15, %v861_v10  ;;  %v3584_v15 = vpack.c.bf16 %v866_v50, %v865_v63 }
 0x543   :  { %1004 = vmatmul.mubr.f32.vlgmr.msra.gmra.mrb[8].mxu0 %v754_v49  ;;  %v863_v49 = vld [vmem:[#allocation8 + $0x2d0] sm:$0xff] }
 0x544   :  { %2759 = vmatpush3.bf16.msra.mxu1 %v3555_v22  ;;  %2582 = vmatpush3.msra.mxu0 %v3363_v9  ;;  %3790 = vst [vmem:[#allocation21_spill] sm:$0xff] %v3572_v23 }
 0x545   :  { %2761 = vmatprep.subr.bf16.mxu1 %v3558_v24  ;;  %2785 = vmatprep.subr.bf16.mxu0 %v3491_v12  ;;  %v3578_v12 = vpack.c.bf16 %v864_v45, %v863_v49  ;;  %v3590_v49 = vpack.c.bf16 %v868_v39, %v867_v31 }
 0x548   :  { %2763 = vmatpush3.bf16.msra.mxu1 %v3562_v33  ;;  %v848_v33 = vld [vmem:[#allocation8 + $0x258] sm:$0xff] }
 0x549   :  { %2765 = vmatprep.subr.bf16.mxu1 %v3565_v0  ;;  %v3581_v10 = vpack.c.bf16 %v848_v33, %v847_v56  ;;  %v849_v0 = vld [vmem:[#allocation8 + $0x260] sm:$0xff] }
 0x54c   :  { %2767 = vmatpush3.bf16.msra.mxu1 %v3569_v21  ;;  %v850_v21 = vld [vmem:[#allocation8 + $0x268] sm:$0xff] }
 0x54d   :  { %2769 = vmatprep.subr.bf16.mxu1 %v3572_v23  ;;  %v3587_v45 = vpack.c.bf16 %v850_v21, %v849_v0  ;;  %v851_v23 = vld [vmem:[#allocation8 + $0x270] sm:$0xff] }
 0x550   :  { %2771 = vmatpush3.bf16.msra.mxu1 %v3575_v52  ;;  %v852_v52 = vld [vmem:[#allocation8 + $0x278] sm:$0xff] }
 0x551   :  { %2773 = vmatprep.subr.bf16.mxu1 %v3578_v12  ;;  %v3593_v33 = vpack.c.bf16 %v852_v52, %v851_v23 }
 0x554   :  { %2775 = vmatpush3.bf16.msra.mxu1 %v3581_v10 }
 0x555   :  { %2777 = vmatprep.subr.bf16.mxu1 %v3584_v15 }
 0x558   :  { %2779 = vmatpush3.bf16.msra.mxu1 %v3587_v45 }
 0x559   :  { %2781 = vmatprep.subr.bf16.mxu1 %v3590_v49 }
 0x55c   :  { %2783 = vmatpush3.bf16.msra.mxu1 %v3593_v33 }
 0x55d   :  { %v2569_v56 = vpop.f32.mrb[14].mxu1  ;;  %2570 = vmatprep.subr.mxu1 %v3363_v9 }
 0x55e   :  { %v764_v63 = vpop.f32.mrb[15].mxu1  ;;  %1073 = vmatprep.mubr.f32.mxu1 %v2569_v56 }
 0x55f   :  { %1074 = vmatmul.mubr.f32.vlgmr.msra.gmra.mrb[18].mxu1 %v764_v63 }
 0x560   :  { %2572 = vmatprep.mubr.f32.mxu1 %v3425_v34 }
 0x565   :  { %2571 = vmatpush3.xpose.msra.mxu1 %v3363_v9 }
 0x566   :  { %2817 = vmatprep.subr.bf16.mxu1 %v3372_v47 }
 0x568   :  { %2573 = vmatmul.mubr.f32.vlgmr.msra.gmra.mrb[20].mxu1 %v3429_v36 }
 0x569   :  { %2575 = vmatprep.mubr.f32.mxu1 %v3427_v35  ;;  %2819 = vmatpush3.bf16.msra.mxu1 %v3374_v53 }
 0x56a   :  { %2821 = vmatprep.subr.bf16.mxu1 %v3377_v54 }
 0x56c   :  { %2576 = vmatmul.mubr.f32.gmra.mrb[22].mxu1 %v3431_v37 }
 0x56d   :  { %2578 = vmatprep.mubr.f32.mxu1 %v3433_v40  ;;  %2823 = vmatpush3.bf16.msra.mxu1 %v3382_v59 }
 0x56e   :  { %2825 = vmatprep.subr.bf16.mxu1 %v3385_v60 }
 0x570   :  { %2579 = vmatmul.mubr.f32.gmra.mrb[24].mxu1 %v3435_v41 }
 0x571   :  { %2827 = vmatpush3.bf16.msra.mxu1 %v3389_v2 }
 0x572   :  { %2829 = vmatprep.subr.bf16.mxu1 %v3392_v3 }
 0x575   :  { %2831 = vmatpush3.bf16.msra.mxu1 %v3395_v7 }
 0x576   :  { %2833 = vmatprep.subr.bf16.mxu1 %v3398_v8 }
 0x579   :  { %2835 = vmatpush3.bf16.msra.mxu1 %v3401_v13 }
 0x57a   :  { %2837 = vmatprep.subr.bf16.mxu1 %v3404_v14 }
 0x57d   :  { %2839 = vmatpush3.bf16.msra.mxu1 %v3407_v19 }
 0x57e   :  { %2841 = vmatprep.subr.bf16.mxu1 %v3410_v20 }
 0x581   :  { %2843 = vmatpush3.bf16.msra.mxu1 %v3413_v25 }
 0x582   :  { %2845 = vmatprep.subr.bf16.mxu1 %v3416_v26 }
 0x585   :  { %2847 = vmatpush3.bf16.msra.mxu1 %v3419_v29 }
 0x612   :  { %v2280_v9 = vpop.f32.mrb[16].mxu1 }
 0x613   :  { %v2281_v47 = vpop.f32.mrb[17].mxu1 }
 0x614   :  { %v2282_v53 = vadd.f32 %v2281_v47, %v2280_v9 }
 0x616   :  { %v2315_v54 = vpop.f32.mrb[8].mxu0 }
 0x617   :  { %v2316_v59 = vpop.f32.mrb[9].mxu0 }
 0x618   :  { %v2317_v60 = vadd.f32 %v2316_v59, %v2315_v54 }
 0x61a   :  { %v1006_v2 = vadd.f32 %v2317_v60, %v2282_v53 }
 0x632   :  { %v2350_v3 = vpop.f32.mrb[18].mxu1 }
 0x633   :  { %v2351_v7 = vpop.f32.mrb[19].mxu1 }
 0x634   :  { %v2352_v8 = vadd.f32 %v2351_v7, %v2350_v3 }
 0x636   :  { %v3621_v13 = vadd.f32 %v2352_v8, %v1006_v2 }
 0x63b   :  { %v2574_v14 = vpop.f32.mrb[20].mxu1 }
 0x63c   :  { %v1168_v19 = vadd.f32 %v2574_v14, %v3440_v1  ;;  %v1162_v20 = vpop.f32.mrb[21].mxu1 }
 0x63d   :  { %v1163_v25 = vadd.f32 %v1162_v20, %v3445_v42 }
 0x63e   :  { %v1194_v26 = vsel %vm593_vm0, %v1168_v19, -inf }
 0x63f   :  { %1195 = vmax.xlane.f32.xlu1 %v1194_v26  ;;  %v2577_v29 = vpop.f32.mrb[22].mxu1  ;;  %v1191_v34 = vsel %vm593_vm0, %v1163_v25, -inf }
 0x640   :  { %v1178_v35 = vadd.f32 %v2577_v29, %v3452_v51  ;;  %v1172_v36 = vpop.f32.mrb[23].mxu1  ;;  %1192 = vmax.xlane.f32.xlu0 %v1191_v34  ;;  %v1079_v34 = vld [vmem:[%s3766_s0] sm:$0xff] }
 0x641   :  { %v1173_v37 = vadd.f32 %v1172_v36, %v3458_v55 }
 0x642   :  { %v1200_v40 = vsel %vm593_vm0, %v1178_v35, -inf }
 0x643   :  { %1201 = vmax.xlane.f32.xlu1 %v1200_v40  ;;  %v2580_v41 = vpop.f32.mrb[24].mxu1  ;;  %v1197_v1 = vsel %vm593_vm0, %v1173_v37, -inf  ;;  %v1080_v40 = vadd.f32 %v1079_v34, %v3621_v13  ;;  %v1748_v34 = vld [vmem:[#allocation10 + $0xc8] sm:$0xff] }
 0x644   :  { %v1188_v42 = vadd.f32 %v2580_v41, %v3468_v4  ;;  %1198 = vmax.xlane.f32.xlu0 %v1197_v1  ;;  %v1182_v0 = vpop.f32.mrb[25].mxu1 }
 0x645   :  { %v1183_v21 = vadd.f32 %v1182_v0, %v3473_v5 }
 0x646   :  { %v1206_v23 = vsel %vm593_vm0, %v1188_v42, -inf }
 0x647   :  { %1207 = vmax.xlane.f32.xlu1 %v1206_v23  ;;  %v1203_v51 = vsel %vm593_vm0, %v1183_v21, -inf }
 0x648   :  { %1204 = vmax.xlane.f32.xlu0 %v1203_v51 }
 0x6cc   :  { %v1196_v52 = vpop.xlane.xlu1 %1195 }
 0x6cd   :  { %v1210_v55 = vsub.f32 %v1168_v19, %v1196_v52  ;;  %v1193_v50 = vpop.xlane.xlu0 %1192 }
 0x6ce   :  { %v1209_v31 = vsub.f32 %v1163_v25, %v1193_v50 }
 0x6cf   :  { %v1217_v39 = vmul.f32 1.442695, %v1210_v55 }
 0x6d0   :  { %v1215_v56 = vmul.f32 1.442695, %v1209_v31  ;;  %v1202_v63 = vpop.xlane.xlu1 %1201 }
 0x6d1   :  { %3048 = vpow2.f32 %v1217_v39  ;;  %v1212_v9 = vsub.f32 %v1178_v35, %v1202_v63  ;;  %v1199_v4 = vpop.xlane.xlu0 %1198 }
 0x6d2   :  { %3050 = vpow2.f32 %v1215_v56  ;;  %v1211_v47 = vsub.f32 %v1173_v37, %v1199_v4 }
 0x6d3   :  { %v1221_v53 = vmul.f32 1.442695, %v1212_v9 }
 0x6d4   :  { %v1219_v5 = vmul.f32 1.442695, %v1211_v47  ;;  %v1208_v54 = vpop.xlane.xlu1 %1207 }
 0x6d5   :  { %3052 = vpow2.f32 %v1221_v53  ;;  %v1214_v59 = vsub.f32 %v1188_v42, %v1208_v54  ;;  %v1205_v60 = vpop.xlane.xlu0 %1204  ;;  %v3648_v42 = vld [vmem:[%s3772_s6] ss:$0 sm:$0xff] }
 0x6d6   :  { %3054 = vpow2.f32 %v1219_v5  ;;  %v1213_v2 = vsub.f32 %v1183_v21, %v1205_v60  ;;  %v3651_v0 = vadd.f32 %v3648_v42, %v1080_v40  ;;  %v3793_v40 = vld [vmem:[#allocation18_spill] sm:$0xff] }
 0x6d7   :  { %v1225_v3 = vmul.f32 1.442695, %v1214_v59 }
 0x6d8   :  { %v1223_v7 = vmul.f32 1.442695, %v1213_v2 }
 0x6d9   :  { %3056 = vpow2.f32 %v1225_v3 }
 0x6da   :  { %3058 = vpow2.f32 %v1223_v7 }
 0x6db   :  { %v3049_v8 = vpop.eup %3048 }
 0x6dc   :  { %v3051_v14 = vpop.eup %3050  ;;  %v1230_v19 = vsel %vm593_vm0, %v3049_v8, 0.0 }
 0x6dd   :  { %1231 = vadd.xlane.f32.xlu1 %v1230_v19  ;;  %v1227_v20 = vsel %vm593_vm0, %v3051_v14, 0.0 }
 0x6de   :  { %1228 = vadd.xlane.f32.xlu0 %v1227_v20 }
 0x6df   :  { %v3053_v25 = vpop.eup %3052 }
 0x6e0   :  { %v3055_v26 = vpop.eup %3054  ;;  %v1236_v29 = vsel %vm593_vm0, %v3053_v25, 0.0 }
 0x6e1   :  { %1237 = vadd.xlane.f32.xlu1 %v1236_v29  ;;  %v1233_v35 = vsel %vm593_vm0, %v3055_v26, 0.0 }
 0x6e2   :  { %1234 = vadd.xlane.f32.xlu0 %v1233_v35  ;;  %v1752_v35 = vld [vmem:[#allocation10 + $0xe8] sm:$0xff] }
 0x6e3   :  { %v3057_v36 = vpop.eup %3056 }
 0x6e4   :  { %v3059_v37 = vpop.eup %3058  ;;  %v1242_v41 = vsel %vm593_vm0, %v3057_v36, 0.0 }
 0x6e5   :  { %1243 = vadd.xlane.f32.xlu1 %v1242_v41  ;;  %v1239_v1 = vsel %vm593_vm0, %v3059_v37, 0.0  ;;  %v3794_v41 = vld [vmem:[#allocation19_spill] sm:$0xff] }
 0x6e6   :  { %1240 = vadd.xlane.f32.xlu0 %v1239_v1  ;;  %v1747_v1 = vld [vmem:[#allocation10 + $0xc0] sm:$0xff] }
 0x6ea   :  { %1685 = vadd.xlane.f32.xlu0 %v3651_v0 }
 0x76a   :  { %v1232_v21 = vpop.xlane.xlu1 %1231 }
 0x76b   :  { %3060 = vrcp.f32 %v1232_v21  ;;  %v1229_v23 = vpop.xlane.xlu0 %1228  ;;  %v1751_v21 = vld [vmem:[#allocation10 + $0xe0] sm:$0xff] }
 0x76c   :  { %3062 = vrcp.f32 %v1229_v23  ;;  %v1756_v23 = vld [vmem:[#allocation10 + $0x108] sm:$0xff] }
 0x76e   :  { %v1238_v13 = vpop.xlane.xlu1 %1237 }
 0x76f   :  { %3064 = vrcp.f32 %v1238_v13  ;;  %v1235_v51 = vpop.xlane.xlu0 %1234  ;;  %v1760_v13 = vld [vmem:[#allocation10 + $0x128] sm:$0xff] }
 0x770   :  { %3066 = vrcp.f32 %v1235_v51  ;;  %v3795_v51 = vld [vmem:[#allocation20_spill] sm:$0xff] }
 0x772   :  { %v1244_v52 = vpop.xlane.xlu1 %1243 }
 0x773   :  { %3068 = vrcp.f32 %v1244_v52  ;;  %v1241_v55 = vpop.xlane.xlu0 %1240  ;;  %v2894_v52 = vpack.c.bf16 %v1751_v21, %v1747_v1 }
 0x774   :  { %3070 = vrcp.f32 %v1241_v55  ;;  %v3796_v55 = vld [vmem:[#allocation21_spill] sm:$0xff] }
 0x775   :  { %v3061_v50 = vpop.eup %3060 }
 0x776   :  { %v3063_v31 = vpop.eup %3062  ;;  %v1248_v63 = vmul.f32 %v3061_v50, %v3049_v8  ;;  %v1740_v8 = vld [vmem:[#allocation10 + $0x88] sm:$0xff]  ;;  %v2896_v50 = vpack.c.bf16 %v1760_v13, %v1756_v23  ;;  %v1757_v23 = vld [vmem:[#allocation10 + $0x110] sm:$0xff] }
 0x777   :  { %v1686_v39 = vpop.xlane.xlu0 %1685  ;;  %v1246_v56 = vmul.f32 %v3063_v31, %v3051_v14  ;;  %v1744_v14 = vld [vmem:[#allocation10 + $0xa8] sm:$0xff]  ;;  %v1755_v31 = vld [vmem:[#allocation10 + $0x100] sm:$0xff]  ;;  %v1761_v13 = vld [vmem:[#allocation10 + $0x130] sm:$0xff] }
 0x778   :  { %v1689_v9 = vmul.f32 0.0078125, %v1686_v39  ;;  %v1759_v39 = vld [vmem:[#allocation10 + $0x120] sm:$0xff] }
 0x779   :  { %v3065_v4 = vpop.eup %3064  ;;  %2583 = vmatprep.mubr.msk.f32.mxu0 %vm593_vm0, %v1246_v56  ;;  %v1764_v56 = vld [vmem:[#allocation10 + $0x148] sm:$0xff] }
 0x77a   :  { %v3067_v47 = vpop.eup %3066  ;;  %v3656_v53 = vsub.f32 %v3651_v0, %v1689_v9  ;;  %2584 = vmatmul.mubr.msk.f32.vlgmr.msra.gmra.mrb[10].mxu0 %vm593_vm0, %v1248_v63  ;;  %v1252_v54 = vmul.f32 %v3065_v4, %v3053_v25  ;;  %v1768_v63 = vld [vmem:[#allocation10 + $0x168] sm:$0xff]  ;;  %v3797_v9 = vld [vmem:[#allocation22_spill] sm:$0xff]  ;;  %v2898_v4 = vpack.c.bf16 %v1759_v39, %v1755_v31 }
 0x77b   :  { %v1250_v5 = vmul.f32 %v3067_v47, %v3055_v26  ;;  %2787 = vmatpush3.bf16.msra.mxu0 %v3494_v30  ;;  %v1724_v30 = vld [vmem:[#allocation10 + $0x8] sm:$0xff]  ;;  %v1739_v26 = vld [vmem:[#allocation10 + $0x80] sm:$0xff]  ;;  %v2900_v47 = vpack.c.bf16 %v1768_v63, %v1764_v56  ;;  %v1765_v31 = vld [vmem:[#allocation10 + $0x150] sm:$0xff] }
 0x77c   :  { %v1693_v59 = vmul.f32 %v3656_v53, %v3656_v53  ;;  %2789 = vmatprep.subr.bf16.mxu0 %v3496_v38  ;;  %v1728_v38 = vld [vmem:[#allocation10 + $0x28] sm:$0xff]  ;;  %v1769_v39 = vld [vmem:[#allocation10 + $0x170] sm:$0xff]  ;;  %v1774_v56 = vld [vmem:[#allocation10 + $0x198] sm:$0xff] }
 0x77d   :  { %v3069_v60 = vpop.eup %3068  ;;  %2586 = vmatprep.mubr.msk.f32.mxu0 %vm593_vm0, %v1250_v5  ;;  %v1763_v5 = vld [vmem:[#allocation10 + $0x140] sm:$0xff]  ;;  %v1778_v63 = vld [vmem:[#allocation10 + $0x1b8] sm:$0xff] }
 0x77e   :  { %v3071_v2 = vpop.eup %3070  ;;  %2587 = vmatmul.mubr.msk.f32.gmra.mrb[12].mxu0 %vm593_vm0, %v1252_v54  ;;  %1695 = vadd.xlane.f32.xlu0 %v1693_v59  ;;  %v1256_v7 = vmul.f32 %v3069_v60, %v3057_v36  ;;  %v3792_v36 = vmov 0.0   ;;  %v1767_v54 = vld [vmem:[#allocation10 + $0x160] sm:$0xff]  ;;  %v1772_v59 = vld [vmem:[#allocation10 + $0x188] sm:$0xff] }
 0x77f   :  { %v1254_v3 = vmul.f32 %v3071_v2, %v3059_v37  ;;  %2791 = vmatpush3.bf16.msra.mxu0 %v3501_v61  ;;  %v2880_v61 = vpack.c.bf16 %v1728_v38, %v1724_v30  ;;  %v1776_v60 = vld [vmem:[#allocation10 + $0x1a8] sm:$0xff]  ;;  %v2902_v2 = vpack.c.bf16 %v1767_v54, %v1763_v5  ;;  %v1775_v30 = vld [vmem:[#allocation10 + $0x1a0] sm:$0xff]  ;;  %v1777_v5 = vld [vmem:[#allocation10 + $0x1b0] sm:$0xff] }
 0x780   :  { %2793 = vmatprep.subr.bf16.mxu0 %v3504_v32  ;;  %v1780_v38 = vld [vmem:[#allocation10 + $0x1c8] sm:$0xff]  ;;  %v1782_v54 = vld [vmem:[#allocation10 + $0x1d8] sm:$0xff] }
 0x781   :  { %2589 = vmatprep.mubr.msk.f32.mxu0 %vm593_vm0, %v1254_v3  ;;  %2881 = vmatprep.subr.bf16.mxu1 %v2880_v61  ;;  %v2904_v3 = vpack.c.bf16 %v1776_v60, %v1772_v59  ;;  %v1786_v59 = vld [vmem:[#allocation10 + $0x1f8] sm:$0xff] }
 0x782   :  { %2590 = vmatmul.mubr.msk.f32.gmra.mrb[14].mxu0 %vm593_vm0, %v1256_v7  ;;  %v1771_v7 = vld [vmem:[#allocation10 + $0x180] sm:$0xff] }
 0x783   :  { %2795 = vmatpush3.bf16.msra.mxu0 %v3509_v44  ;;  %v1723_v44 = vld [vmem:[#allocation10] sm:$0xff] }
 0x784   :  { %2797 = vmatprep.subr.bf16.mxu0 %v3512_v46  ;;  %v1727_v46 = vld [vmem:[#allocation10 + $0x20] sm:$0xff] }
 0x787   :  { %2799 = vmatpush3.bf16.msra.mxu0 %v3515_v17 }
 0x788   :  { %2801 = vmatprep.subr.bf16.mxu0 %v3518_v18  ;;  %v1732_v18 = vld [vmem:[#allocation10 + $0x48] sm:$0xff] }
 0x78b   :  { %2803 = vmatpush3.bf16.msra.mxu0 %v3521_v27  ;;  %v1736_v27 = vld [vmem:[#allocation10 + $0x68] sm:$0xff] }
 0x78c   :  { %2805 = vmatprep.subr.bf16.mxu0 %v3524_v28  ;;  %v2882_v28 = vpack.c.bf16 %v1727_v46, %v1723_v44  ;;  %v1730_v44 = vld [vmem:[#allocation10 + $0x38] sm:$0xff]  ;;  %v2906_v46 = vpack.c.bf16 %v1775_v30, %v1771_v7  ;;  %v1785_v7 = vld [vmem:[#allocation10 + $0x1f0] sm:$0xff] }
 0x78f   :  { %2807 = vmatpush3.bf16.msra.mxu0 %v3527_v57 }
 0x790   :  { %2809 = vmatprep.subr.bf16.mxu0 %v3530_v58 }
 0x793   :  { %2811 = vmatpush3.bf16.msra.mxu0 %v3533_v11  ;;  %v2884_v11 = vpack.c.bf16 %v1736_v27, %v1732_v18  ;;  %v1725_v27 = vld [vmem:[#allocation10 + $0x10] sm:$0xff] }
 0x794   :  { %2813 = vmatprep.subr.bf16.mxu0 %v3536_v43  ;;  %v1731_v43 = vld [vmem:[#allocation10 + $0x40] sm:$0xff] }
 0x797   :  { %2815 = vmatpush3.bf16.msra.mxu0 %v3539_v16  ;;  %v1735_v16 = vld [vmem:[#allocation10 + $0x60] sm:$0xff] }
 0x798   :  { %2849 = vmatprep.subr.bf16.mxu0 %v3547_v48  ;;  %v2886_v20 = vpack.c.bf16 %v1735_v16, %v1731_v43 }
 0x80b   :  { %v1696_v57 = vpop.xlane.xlu0 %1695 }
 0x80c   :  { %v1699_v19 = vmul.f32 0.0078125, %v1696_v57 }
 0x80e   :  { %v1701_v37 = vadd.f32 1e-05, %v1699_v19  ;;  %v1742_v19 = vld [vmem:[#allocation10 + $0x98] sm:$0xff] }
 0x810   :  { %3072 = vrsqrt.f32 %v1701_v37 }
 0x81a   :  { %v3073_v61 = vpop.eup %3072 }
 0x81b   :  { %v1705_v57 = vmul.f32 %v3073_v61, %v3656_v53  ;;  %v3709_v53 = vld [vmem:[%s3774_s8] ss:$0 sm:$0xff] }
 0x84d   :  { %v2585_v32 = vpop.f32.mrb[10].mxu0 }
 0x84e   :  { %v1341_v17 = vpop.f32.mrb[11].mxu0  ;;  %1530 = vmatprep.mubr.f32.mxu0 %v2585_v32  ;;  %v1784_v32 = vld [vmem:[#allocation10 + $0x1e8] sm:$0xff] }
 0x84f   :  { %1531 = vmatmul.mubr.f32.vlgmr.msra.gmra.mrb[16].mxu0 %v1341_v17  ;;  %v1779_v17 = vld [vmem:[#allocation10 + $0x1c0] sm:$0xff] }
 0x850   :  { %2851 = vmatpush3.bf16.msra.mxu0 %v3550_v62  ;;  %v2888_v62 = vpack.c.bf16 %v1744_v14, %v1740_v8  ;;  %v1733_v8 = vld [vmem:[#allocation10 + $0x50] sm:$0xff] }
 0x851   :  { %v2588_v58 = vpop.f32.mrb[12].mxu0  ;;  %2853 = vmatprep.subr.bf16.mxu0 %v3552_v6  ;;  %v1743_v6 = vld [vmem:[#allocation10 + $0xa0] sm:$0xff]  ;;  %v1737_v14 = vld [vmem:[#allocation10 + $0x70] sm:$0xff] }
 0x852   :  { %v1351_v48 = vpop.f32.mrb[13].mxu0  ;;  %1600 = vmatprep.mubr.f32.mxu1 %v2588_v58  ;;  %v3702_v58 = vld [vmem:[%s3773_s7] ss:$0 sm:$0xff] }
 0x853   :  { %1601 = vmatmul.mubr.f32.vlgmr.msra.gmra.mrb[26].mxu1 %v1351_v48  ;;  %v1713_v16 = vmul.f32 %v3702_v58, %v1705_v57 }
 0x854   :  { %2855 = vmatpush3.bf16.msra.mxu0 %v3555_v22  ;;  %2883 = vmatpush1.bf16.msra.mxu1 %v2882_v28  ;;  %v2890_v22 = vpack.c.bf16 %v1743_v6, %v1739_v26  ;;  %v1729_v28 = vld [vmem:[#allocation10 + $0x30] sm:$0xff] }
 0x855   :  { %v2591_v25 = vpop.f32.mrb[14].mxu0  ;;  %2857 = vmatprep.subr.bf16.mxu0 %v3558_v24  ;;  %2885 = vmatprep.subr.bf16.mxu1 %v2884_v11  ;;  %v2892_v24 = vpack.c.bf16 %v1752_v35, %v1748_v34  ;;  %v1734_v11 = vld [vmem:[#allocation10 + $0x58] sm:$0xff]  ;;  %v1741_v26 = vld [vmem:[#allocation10 + $0x90] sm:$0xff] }
 0x856   :  { %v3685_v29 = vpop.f32.mrb[15].mxu0  ;;  %1670 = vmatprep.mubr.f32.mxu0 %v2591_v25  ;;  %1873 = vmatprep.mubr.f32.mxu1 %v3792_v36  ;;  %v1721_v25 = vadd.f32 %v3709_v53, %v1713_v16  ;;  %v1745_v6 = vld [vmem:[#allocation10 + $0xb0] sm:$0xff]  ;;  %v1750_v34 = vld [vmem:[#allocation10 + $0xd8] sm:$0xff]  ;;  %v2019_v16 = vld [vmem:[#allocation11 + $0x180] sm:$0xff] }
 0x857   :  { %v1754_v35 = vld [vmem:[#allocation10 + $0xf8] sm:$0xff]  ;;  %v2922_v37 = vpack.c.bf16 %v1745_v6, %v1741_v26  ;;  %v2004_v26 = vld [vmem:[#allocation11 + $0x108] sm:$0xff]  ;;  %v1989_v6 = vld [vmem:[#allocation11 + $0x90] sm:$0xff] }
 0x858   :  { %2859 = vmatpush3.bf16.msra.mxu0 %v3793_v40  ;;  %2887 = vmatpush1.bf16.msra.mxu1 %v2886_v20  ;;  %v1746_v20 = vld [vmem:[#allocation10 + $0xb8] sm:$0xff]  ;;  %v1749_v40 = vld [vmem:[#allocation10 + $0xd0] sm:$0xff] }
 0x859   :  { %2861 = vmatprep.subr.bf16.mxu0 %v3794_v41  ;;  %2889 = vmatprep.subr.bf16.mxu1 %v2888_v62  ;;  %v2920_v62 = vpack.c.bf16 %v1746_v20, %v1742_v19  ;;  %v1758_v41 = vld [vmem:[#allocation10 + $0x118] sm:$0xff]  ;;  %v1972_v19 = vld [vmem:[#allocation11 + $0x8] sm:$0xff] }
 0x85c   :  { %2863 = vmatpush3.bf16.msra.mxu0 %v3795_v51  ;;  %2891 = vmatpush1.bf16.msra.mxu1 %v2890_v22  ;;  %v1753_v22 = vld [vmem:[#allocation10 + $0xf0] sm:$0xff]  ;;  %v1766_v51 = vld [vmem:[#allocation10 + $0x158] sm:$0xff] }
 0x85d   :  { %2865 = vmatprep.subr.bf16.mxu0 %v3796_v55  ;;  %2893 = vmatprep.subr.bf16.mxu1 %v2892_v24  ;;  %v1762_v24 = vld [vmem:[#allocation10 + $0x138] sm:$0xff]  ;;  %v2926_v1 = vpack.c.bf16 %v1753_v22, %v1749_v40  ;;  %v2930_v55 = vpack.c.bf16 %v1761_v13, %v1757_v23 }
 0x85e   :  { %v2928_v21 = vpack.c.bf16 %v1762_v24, %v1758_v41  ;;  %v1973_v41 = vld [vmem:[#allocation11 + $0x10] sm:$0xff]  ;;  %v1974_v24 = vld [vmem:[#allocation11 + $0x18] sm:$0xff] }
 0x85f   :  { %v2006_v23 = vld [vmem:[#allocation11 + $0x118] sm:$0xff] }
 0x860   :  { %2867 = vmatpush3.bf16.msra.mxu0 %v3797_v9  ;;  %2895 = vmatpush1.bf16.msra.mxu1 %v2894_v52  ;;  %v1770_v52 = vld [vmem:[#allocation10 + $0x178] sm:$0xff]  ;;  %v2934_v9 = vpack.c.bf16 %v1769_v39, %v1765_v31  ;;  %v1991_v31 = vld [vmem:[#allocation11 + $0xa0] sm:$0xff]  ;;  %v1992_v39 = vld [vmem:[#allocation11 + $0xa8] sm:$0xff] }
 0x861   :  { %2869 = vmatprep.subr.bf16.mxu0 %v3578_v12  ;;  %2897 = vmatprep.subr.bf16.mxu1 %v2896_v50  ;;  %v1726_v12 = vld [vmem:[#allocation10 + $0x18] sm:$0xff]  ;;  %v2932_v50 = vpack.c.bf16 %v1770_v52, %v1766_v51 }
 0x862   :  { %v2912_v18 = vpack.c.bf16 %v1730_v44, %v1726_v12 }
 0x864   :  { %2871 = vmatpush3.bf16.msra.mxu0 %v3581_v10  ;;  %2899 = vmatpush1.bf16.msra.mxu1 %v2898_v4  ;;  %v2908_v10 = vpack.c.bf16 %v1784_v32, %v1780_v38  ;;  %v2936_v4 = vpack.c.bf16 %v1778_v63, %v1774_v56  ;;  %v2023_v56 = vld [vmem:[#allocation11 + $0x1a0] sm:$0xff]  ;;  %v2952_v63 = vpack.c.bf16 %v1992_v39, %v1991_v31 }
 0x865   :  { %2873 = vmatprep.subr.bf16.mxu0 %v3584_v15  ;;  %2901 = vmatprep.subr.bf16.mxu1 %v2900_v47  ;;  %v1783_v15 = vld [vmem:[#allocation10 + $0x1e0] sm:$0xff]  ;;  %v1773_v47 = vld [vmem:[#allocation10 + $0x190] sm:$0xff] }
 0x866   :  { %v2910_v43 = vpack.c.bf16 %v1783_v15, %v1779_v17  ;;  %v2938_v60 = vpack.c.bf16 %v1777_v5, %v1773_v47  ;;  %v1976_v47 = vld [vmem:[#allocation11 + $0x28] sm:$0xff]  ;;  %v2015_v39 = vld [vmem:[#allocation11 + $0x160] sm:$0xff] }
 0x868   :  { %2875 = vmatpush3.bf16.msra.mxu0 %v3587_v45  ;;  %2903 = vmatpush1.bf16.msra.mxu1 %v2902_v2  ;;  %v1738_v45 = vld [vmem:[#allocation10 + $0x78] sm:$0xff]  ;;  %v2940_v2 = vpack.c.bf16 %v1786_v59, %v1782_v54  ;;  %v2007_v59 = vld [vmem:[#allocation11 + $0x120] sm:$0xff] }
 0x869   :  { %2877 = vmatprep.subr.bf16.mxu0 %v3590_v49  ;;  %2905 = vmatprep.subr.bf16.mxu1 %v2904_v3  ;;  %v2914_v49 = vpack.c.bf16 %v1729_v28, %v1725_v27  ;;  %v2916_v48 = vpack.c.bf16 %v1738_v45, %v1734_v11  ;;  %v1781_v3 = vld [vmem:[#allocation10 + $0x1d0] sm:$0xff]  ;;  %v2230_v27 = vld [vmem:[%s3766_s0 + $0x8] sm:$0xff] }
 0x86a   :  { %v2942_v30 = vpack.c.bf16 %v1785_v7, %v1781_v3  ;;  %v1993_v3 = vld [vmem:[#allocation11 + $0xb0] sm:$0xff]  ;;  %v1994_v7 = vld [vmem:[#allocation11 + $0xb8] sm:$0xff] }
 0x86c   :  { %2879 = vmatpush3.bf16.msra.mxu0 %v3593_v33  ;;  %2907 = vmatpush1.bf16.msra.mxu1 %v2906_v46  ;;  %v2918_v33 = vpack.c.bf16 %v1737_v14, %v1733_v8  ;;  %v2020_v8 = vld [vmem:[#allocation11 + $0x188] sm:$0xff]  ;;  %v1971_v14 = vld [vmem:[#allocation11] sm:$0xff] }
 0x86d   :  { %2909 = vmatprep.subr.bf16.mxu1 %v2908_v10  ;;  %2913 = vmatprep.subr.bf16.mxu0 %v2912_v18 }
 0x86f   :  { %1671 = vmatmul.mubr.f32.vlgmr.msra.gmra.mrb[18].mxu0 %v3685_v29  ;;  %v2924_v29 = vpack.c.bf16 %v1754_v35, %v1750_v34  ;;  %v1990_v35 = vld [vmem:[#allocation11 + $0x98] sm:$0xff] }
 0x870   :  { %2911 = vmatpush1.bf16.msra.mxu1 %v2910_v43  ;;  %2915 = vmatpush1.bf16.msra.mxu0 %v2914_v49  ;;  %v1987_v43 = vld [vmem:[#allocation11 + $0x80] sm:$0xff]  ;;  %v1988_v49 = vld [vmem:[#allocation11 + $0x88] sm:$0xff]  ;;  %v2948_v40 = vpack.c.bf16 %v1990_v35, %v1989_v6  ;;  %v2029_v6 = vld [vmem:[#allocation11 + $0x1d0] sm:$0xff] }
 0x871   :  { %2917 = vmatprep.subr.bf16.mxu0 %v2916_v48  ;;  %1950 = vmatprep.mubr.f32.mxu0 %v3792_v36  ;;  %v2944_v48 = vpack.c.bf16 %v1988_v49, %v1987_v43  ;;  %v1981_v35 = vld [vmem:[#allocation11 + $0x50] sm:$0xff] }
 0x873   :  { %1874 = vmatmul.mubr.f32.vlgmr.msra.gmra.mrb[28].mxu1 %v1721_v25  ;;  %2945 = vmatprep.subr.bf16.mxu1 %v2944_v48  ;;  %v1980_v48 = vld [vmem:[#allocation11 + $0x48] sm:$0xff] }
 0x874   :  { %2919 = vmatpush1.bf16.msra.mxu0 %v2918_v33  ;;  %1879 = vmatprep.mubr.f32.mxu1 %v3792_v36  ;;  %v2976_v33 = vpack.c.bf16 %v2020_v8, %v2019_v16  ;;  %v1979_v16 = vld [vmem:[#allocation11 + $0x40] sm:$0xff] }
 0x875   :  { %2921 = vmatprep.subr.bf16.mxu0 %v2920_v62  ;;  %v2003_v62 = vld [vmem:[#allocation11 + $0x100] sm:$0xff] }
 0x876   :  { %v2011_v8 = vld [vmem:[#allocation11 + $0x140] sm:$0xff] }
 0x878   :  { %2923 = vmatpush1.bf16.msra.mxu0 %v2922_v37  ;;  %v2021_v37 = vld [vmem:[#allocation11 + $0x190] sm:$0xff] }
 0x879   :  { %2925 = vmatprep.subr.bf16.mxu0 %v2924_v29  ;;  %v2022_v29 = vld [vmem:[#allocation11 + $0x198] sm:$0xff] }
 0x87a   :  { %v2980_v22 = vpack.c.bf16 %v2022_v29, %v2021_v37  ;;  %v1982_v29 = vld [vmem:[#allocation11 + $0x58] sm:$0xff] }
 0x87c   :  { %2927 = vmatpush1.bf16.msra.mxu0 %v2926_v1  ;;  %v2005_v1 = vld [vmem:[#allocation11 + $0x110] sm:$0xff] }
 0x87d   :  { %2929 = vmatprep.subr.bf16.mxu0 %v2928_v21  ;;  %v2950_v21 = vpack.c.bf16 %v1974_v24, %v1973_v41  ;;  %v2982_v13 = vpack.c.bf16 %v2006_v23, %v2005_v1  ;;  %v2966_v41 = vpack.c.bf16 %v1982_v29, %v1981_v35  ;;  %v1999_v24 = vld [vmem:[#allocation11 + $0xe0] sm:$0xff]  ;;  %v2000_v1 = vld [vmem:[#allocation11 + $0xe8] sm:$0xff] }
 0x880   :  { %2931 = vmatpush1.bf16.msra.mxu0 %v2930_v55 }
 0x881   :  { %2933 = vmatprep.subr.bf16.mxu0 %v2932_v50 }
 0x884   :  { %2935 = vmatpush1.bf16.msra.mxu0 %v2934_v9  ;;  %v2024_v9 = vld [vmem:[#allocation11 + $0x1a8] sm:$0xff] }
 0x885   :  { %2937 = vmatprep.subr.bf16.mxu0 %v2936_v4  ;;  %v1975_v4 = vld [vmem:[#allocation11 + $0x20] sm:$0xff]  ;;  %v2984_v5 = vpack.c.bf16 %v2024_v9, %v2023_v56  ;;  %v2016_v56 = vld [vmem:[#allocation11 + $0x168] sm:$0xff] }
 0x886   :  { %v2954_v54 = vpack.c.bf16 %v1976_v47, %v1975_v4  ;;  %v3002_v9 = vpack.c.bf16 %v2016_v56, %v2015_v39  ;;  %v2001_v4 = vld [vmem:[#allocation11 + $0xf0] sm:$0xff]  ;;  %v2002_v47 = vld [vmem:[#allocation11 + $0xf8] sm:$0xff] }
 0x888   :  { %2939 = vmatpush1.bf16.msra.mxu0 %v2938_v60  ;;  %v2008_v60 = vld [vmem:[#allocation11 + $0x128] sm:$0xff] }
 0x889   :  { %2941 = vmatprep.subr.bf16.mxu0 %v2940_v2  ;;  %v2986_v2 = vpack.c.bf16 %v2008_v60, %v2007_v59  ;;  %v2034_v59 = vld [vmem:[#allocation11 + $0x1f8] sm:$0xff]  ;;  %v1985_v60 = vld [vmem:[#allocation11 + $0x70] sm:$0xff] }
 0x88c   :  { %2943 = vmatpush1.bf16.msra.mxu0 %v2942_v30  ;;  %v2025_v30 = vld [vmem:[#allocation11 + $0x1b0] sm:$0xff] }
 0x88d   :  { %2977 = vmatprep.subr.bf16.mxu0 %v2976_v33  ;;  %v1997_v33 = vld [vmem:[#allocation11 + $0xd0] sm:$0xff] }
 0x88f   :  { %1951 = vmatmul.mubr.f32.vlgmr.msra.gmra.mrb[20].mxu0 %v1721_v25  ;;  %v2946_v25 = vpack.c.bf16 %v1972_v19, %v1971_v14  ;;  %v2962_v14 = vpack.c.bf16 %v1980_v48, %v1979_v16  ;;  %v2012_v19 = vld [vmem:[#allocation11 + $0x148] sm:$0xff] }
 0x890   :  { %1956 = vmatprep.mubr.f32.mxu0 %v3792_v36 }
 0x891   :  { %2947 = vmatpush3.bf16.msra.mxu1 %v2946_v25  ;;  %v1998_v25 = vld [vmem:[#allocation11 + $0xd8] sm:$0xff] }
 0x892   :  { %2949 = vmatprep.subr.bf16.mxu1 %v2948_v40  ;;  %v2013_v40 = vld [vmem:[#allocation11 + $0x150] sm:$0xff] }
 0x895   :  { %2951 = vmatpush3.bf16.msra.mxu1 %v2950_v21  ;;  %v2031_v21 = vld [vmem:[#allocation11 + $0x1e0] sm:$0xff] }
 0x896   :  { %2953 = vmatprep.subr.bf16.mxu1 %v2952_v63 }
 0x899   :  { %2955 = vmatpush3.bf16.msra.mxu1 %v2954_v54  ;;  %v2972_v54 = vpack.c.bf16 %v2002_v47, %v2001_v4 }
 0x922   :  { %v2399_v38 = vpop.f32.mrb[16].mxu0 }
 0x923   :  { %v2400_v61 = vpop.f32.mrb[17].mxu0 }
 0x924   :  { %v2401_v32 = vadd.f32 %v2400_v61, %v2399_v38  ;;  %v2956_v38 = vpack.c.bf16 %v1994_v7, %v1993_v3  ;;  %v2026_v61 = vld [vmem:[#allocation11 + $0x1b8] sm:$0xff] }
 0x926   :  { %v2434_v12 = vpop.f32.mrb[26].mxu1  ;;  %2957 = vmatprep.subr.bf16.mxu1 %v2956_v38  ;;  %v2018_v38 = vld [vmem:[#allocation11 + $0x178] sm:$0xff] }
 0x927   :  { %v2435_v44 = vpop.f32.mrb[27].mxu1 }
 0x928   :  { %v2436_v46 = vadd.f32 %v2435_v44, %v2434_v12  ;;  %v1978_v12 = vld [vmem:[#allocation11 + $0x38] sm:$0xff]  ;;  %v2988_v44 = vpack.c.bf16 %v2026_v61, %v2025_v30  ;;  %v2017_v30 = vld [vmem:[#allocation11 + $0x170] sm:$0xff] }
 0x929   :  { %v3006_v61 = vpack.c.bf16 %v2018_v38, %v2017_v30 }
 0x92a   :  { %v1603_v17 = vadd.f32 %v2436_v46, %v2401_v32  ;;  %v1977_v32 = vld [vmem:[#allocation11 + $0x30] sm:$0xff] }
 0x92b   :  { %v2958_v46 = vpack.c.bf16 %v1978_v12, %v1977_v32  ;;  %v1789_v12 = vlaneseq }
 0x92d   :  { %2959 = vmatpush3.bf16.msra.mxu1 %v2958_v46 }
 0x942   :  { %v2469_v10 = vpop.f32.mrb[18].mxu0 }
 0x943   :  { %v2470_v18 = vpop.f32.mrb[19].mxu0 }
 0x944   :  { %v2471_v15 = vadd.f32 %v2470_v18, %v2469_v10  ;;  %v2010_v10 = vld [vmem:[#allocation11 + $0x138] sm:$0xff]  ;;  %v1995_v18 = vld [vmem:[#allocation11 + $0xc0] sm:$0xff] }
 0x946   :  { %v1673_v28 = vadd.f32 %v2471_v15, %v1603_v17  ;;  %v3719_v57 = vpop.f32.mrb[28].mxu1  ;;  %v2009_v17 = vld [vmem:[#allocation11 + $0x130] sm:$0xff] }
 0x947   :  { %v3721_v11 = vpop.f32.mrb[29].mxu1  ;;  %v2990_v15 = vpack.c.bf16 %v2010_v10, %v2009_v17  ;;  %v1790_v17 = vshrl.u32 %v1789_v12, 7 }
 0x948   :  { %v1678_v36 = vadd.f32 %v2230_v27, %v1673_v28  ;;  %v1996_v27 = vld [vmem:[#allocation11 + $0xc8] sm:$0xff]  ;;  %v2027_v28 = vld [vmem:[#allocation11 + $0x1c0] sm:$0xff] }
 0x949   :  { %v2960_v43 = vpack.c.bf16 %v1996_v27, %v1995_v18  ;;  %v1795_v10 = vsub.s32 1, %v1790_v17  ;;  %v1803_v18 = vsub.s32 3, %v1790_v17  ;;  %v1791_v27 = vsub.s32 0, %v1790_v17 }
 0x94a   :  { %v3724_v45 = vadd.f32 %v3648_v42, %v1678_v36  ;;  %v2978_v42 = vpack.c.bf16 %v2004_v26, %v2003_v62  ;;  %v2028_v36 = vld [vmem:[#allocation11 + $0x1c8] sm:$0xff]  ;;  %v2994_v62 = vpack.c.bf16 %v2012_v19, %v2011_v8  ;;  %v2964_v26 = vpack.c.bf16 %v1998_v25, %v1997_v33 }
 0x94b   :  { %v2992_v49 = vpack.c.bf16 %v2028_v36, %v2027_v28  ;;  %2961 = vmatprep.subr.bf16.mxu1 %v2960_v43  ;;  %v1799_v28 = vsub.s32 2, %v1790_v17 }
 0x94c   :  { %1687 = vadd.xlane.f32.xlu1 %v3724_v45  ;;  %2979 = vmatpush3.bf16.msra.mxu0 %v2978_v42  ;;  %v2030_v42 = vld [vmem:[#allocation11 + $0x1d8] sm:$0xff] }
 0x94d   :  { %2981 = vmatprep.subr.bf16.mxu0 %v2980_v22  ;;  %v2996_v37 = vpack.c.bf16 %v2030_v42, %v2029_v6  ;;  %v2014_v22 = vld [vmem:[#allocation11 + $0x158] sm:$0xff]  ;;  %2963 = vmatpush3.bf16.msra.mxu1 %v2962_v14 }
 0x94e   :  { %2965 = vmatprep.subr.bf16.mxu1 %v2964_v26  ;;  %v2998_v23 = vpack.c.bf16 %v2014_v22, %v2013_v40 }
 0x950   :  { %2983 = vmatpush3.bf16.msra.mxu0 %v2982_v13  ;;  %v2968_v13 = vpack.c.bf16 %v2000_v1, %v1999_v24 }
 0x951   :  { %2985 = vmatprep.subr.bf16.mxu0 %v2984_v5  ;;  %2967 = vmatpush3.bf16.msra.mxu1 %v2966_v41  ;;  %v2033_v5 = vld [vmem:[#allocation11 + $0x1f0] sm:$0xff] }
 0x952   :  { %2969 = vmatprep.subr.bf16.mxu1 %v2968_v13  ;;  %v3004_v3 = vpack.c.bf16 %v2034_v59, %v2033_v5 }
 0x954   :  { %2987 = vmatpush3.bf16.msra.mxu0 %v2986_v2  ;;  %v1986_v2 = vld [vmem:[#allocation11 + $0x78] sm:$0xff] }
 0x955   :  { %2989 = vmatprep.subr.bf16.mxu0 %v2988_v44  ;;  %v2974_v7 = vpack.c.bf16 %v1986_v2, %v1985_v60 }
 0x958   :  { %2991 = vmatpush3.bf16.msra.mxu0 %v2990_v15  ;;  %v1787_v15 = vld [vmem:[%s3776_s10] sm:$0xf] }
 0x959   :  { %2993 = vmatprep.subr.bf16.mxu0 %v2992_v49  ;;  %v1796_v36 = vrot.slane %v1787_v15, %v1795_v10  ;;  %v1804_v43 = vrot.slane %v1787_v15, %v1803_v18  ;;  %v1792_v16 = vrot.slane %v1787_v15, %v1791_v27  ;;  %v1800_v48 = vrot.slane %v1787_v15, %v1799_v28 }
 0x95b   :  { %v1878_v14 = vadd.f32 %v3721_v11, %v1796_v36  ;;  %v1876_v25 = vadd.f32 %v3719_v57, %v1792_v16 }
 0x95c   :  { %2995 = vmatpush3.bf16.msra.mxu0 %v2994_v62 }
 0x95d   :  { %2997 = vmatprep.subr.bf16.mxu0 %v2996_v37  ;;  %v1964_v6 = vmax.f32 %v1878_v14, 0.0  ;;  %v1963_v35 = vmax.f32 %v1876_v25, 0.0 }
 0x960   :  { %2999 = vmatpush3.bf16.msra.mxu0 %v2998_v23  ;;  %v2233_v23 = vld [vmem:[%s3778_s12] ss:$0 sm:$0xff]  ;;  %s3205_s12 = smov [#allocation13]  }
 0x961   :  { %s2201_s26 = sshll.u32 %s3205_s12, 4  ;;  %s2202_s26 = int_to_ptr.vmem [resolvable:$true] %s2201_s26 }
 0x962   :  { %v3727_v20 = vpop.f32.mrb[20].mxu0  ;;  %s3164_s2 = scalar_lea.vmem %s2202_s26, 256  ;;  %p3169_p5 = scmp.lt.s32.totalorder %s2202_s26, %s2202_s26 }
 0x963   :  { %v3729_v34 = vpop.f32.mrb[21].mxu0  ;;  %v1953_v62 = vadd.f32 %v3727_v20, %v1800_v48  ;;  %p3165_p4 = scmp.ne.s32.totalorder %s2202_s26, %s3164_s2  ;;  %p3170_p6 = scmp.lt.s32.totalorder %s3164_s2, %s3164_s2 }
 0x964   :  { %v1955_v19 = vadd.f32 %v3729_v34, %v1804_v43 }
 0x965   :  { %p3171_p7 = por %p3170_p6, %p3169_p5 }
 0x966   :  { %v1966_v42 = vmax.f32 %v1955_v19, 0.0 }
 0x967   :  { %p3172_p8 = pnand %p3171_p7, %p3165_p4 }
 0x9d9   :  { %v1688_v51 = vpop.xlane.xlu1 %1687 }
 0x9da   :  { %v1690_v52 = vmul.f32 0.0078125, %v1688_v51  ;;  %v2032_v51 = vld [vmem:[#allocation11 + $0x1e8] sm:$0xff] }
 0x9db   :  { %v3000_v31 = vpack.c.bf16 %v2032_v51, %v2031_v21 }
 0x9dc   :  { %v3732_v55 = vsub.f32 %v3724_v45, %v1690_v52  ;;  %v1983_v52 = vld [vmem:[#allocation11 + $0x60] sm:$0xff] }
 0x9dd   :  { %3001 = vmatprep.subr.bf16.mxu0 %v3000_v31 }
 0x9de   :  { %v1694_v50 = vmul.f32 %v3732_v55, %v3732_v55  ;;  %3003 = vmatpush3.bf16.msra.mxu0 %v3002_v9 }
 0x9df   :  { %3005 = vmatprep.subr.bf16.mxu0 %v3004_v3 }
 0x9e0   :  { %1697 = vadd.xlane.f32.xlu1 %v1694_v50  ;;  %v1984_v50 = vld [vmem:[#allocation11 + $0x68] sm:$0xff] }
 0x9e1   :  { %v2970_v63 = vpack.c.bf16 %v1984_v50, %v1983_v52 }
 0x9e2   :  { %3007 = vmatpush3.bf16.msra.mxu0 %v3006_v61 }
 0x9e3   :  { %2971 = vmatpush3.bf16.msra.mxu1 %v2970_v63 }
 0x9e4   :  { %2973 = vmatprep.subr.bf16.mxu1 %v2972_v54 }
 0x9e7   :  { %2975 = vmatpush3.bf16.msra.mxu1 %v2974_v7 }
 0xa6d   :  { %v1698_v32 = vpop.xlane.xlu1 %1697 }
 0xa6e   :  { %v1700_v44 = vmul.f32 0.0078125, %v1698_v32 }
 0xa70   :  { %v1702_v46 = vadd.f32 1e-05, %v1700_v44 }
 0xa72   :  { %3074 = vrsqrt.f32 %v1702_v46 }
 0xa7c   :  { %v3075_v49 = vpop.eup %3074 }
 0xa7d   :  { %v1706_v8 = vmul.f32 %v3075_v49, %v3732_v55  ;;  %v1965_v55 = vmax.f32 %v1953_v62, 0.0 }
 0xa7f   :  { %v1714_v33 = vmul.f32 %v3702_v58, %v1706_v8 }
 0xa81   :  { %v1722_v26 = vadd.f32 %v3709_v53, %v1714_v33 }
 0xa83   :  { %1880 = vmatmul.mubr.f32.gmra.mrb[30].mxu1 %v1722_v26  ;;  %1957 = vmatmul.mubr.f32.gmra.mrb[22].mxu0 %v1722_v26 }
 0xa84   :  { %2106 = vmatprep.mubr.f32.mxu1 %v1964_v6  ;;  %2181 = vmatprep.mubr.f32.mxu0 %v1966_v42 }
 0xa87   :  { %2107 = vmatmul.mubr.f32.vlgmr.msra.gmra.mrb[32].mxu1 %v1963_v35  ;;  %2182 = vmatmul.mubr.f32.vlgmr.msra.gmra.mrb[24].mxu0 %v1965_v55 }
 0xb56   :  { %v1881_v11 = vpop.f32.mrb[30].mxu1  ;;  %v1958_v34 = vpop.f32.mrb[22].mxu0 }
 0xb57   :  { %v1882_v37 = vadd.f32 %v1881_v11, %v1792_v16  ;;  %v1959_v58 = vadd.f32 %v1958_v34, %v1800_v48  ;;  %v1883_v29 = vpop.f32.mrb[31].mxu1  ;;  %v1960_v57 = vpop.f32.mrb[23].mxu0 }
 0xb58   :  { %v1884_v40 = vadd.f32 %v1883_v29, %v1796_v36  ;;  %v1961_v20 = vadd.f32 %v1960_v57, %v1804_v43 }
 0xb59   :  { %v1967_v1 = vmax.f32 %v1882_v37, 0.0  ;;  %v1969_v21 = vmax.f32 %v1959_v58, 0.0 }
 0xb5a   :  { %v1968_v22 = vmax.f32 %v1884_v40, 0.0  ;;  %v1970_v53 = vmax.f32 %v1961_v20, 0.0  ;;  %v2504_v41 = vpop.f32.mrb[32].mxu1  ;;  %v2542_v24 = vpop.f32.mrb[24].mxu0 }
 0xb5b   :  { %v2505_v13 = vpop.f32.mrb[33].mxu1  ;;  %v2543_v51 = vpop.f32.mrb[25].mxu0 }
 0xb5c   :  { %v2506_v52 = vadd.f32 %v2505_v13, %v2504_v41  ;;  %v2544_v50 = vadd.f32 %v2543_v51, %v2542_v24  ;;  %2111 = vmatprep.mubr.f32.mxu1 %v1968_v22  ;;  %2186 = vmatprep.mubr.f32.mxu0 %v1970_v53 }
 0xb5d   :  { %2112 = vmatmul.mubr.f32.gmra.mrb[34].mxu1 %v1967_v1  ;;  %2187 = vmatmul.mubr.f32.gmra.mrb[26].mxu0 %v1969_v21 }
 0xb5e   :  { %v2109_v31 = vadd.f32 %v2506_v52, %v2233_v23 }
 0xb60   :  { %v2184_v39 = vadd.f32 %v2544_v50, %v2109_v31 }
 0xb62   :  { %v2192_v56 = vadd.f32 %v2184_v39, %v3651_v0 }
 0xb64   :  { %2194 = vst [vmem:[#allocation13] sm:$0xff] %v2192_v56 }
 0xc30   :  { %v2507_v63 = vpop.f32.mrb[34].mxu1  ;;  %v2545_v9 = vpop.f32.mrb[26].mxu0 }
 0xc31   :  { %v2508_v4 = vpop.f32.mrb[35].mxu1  ;;  %v2546_v47 = vpop.f32.mrb[27].mxu0 }
 0xc32   :  { %v2509_v5 = vadd.f32 %v2508_v4, %v2507_v63  ;;  %v2547_v54 = vadd.f32 %v2546_v47, %v2545_v9 }
 0xc34   :  { %v2114_v59 = vadd.f32 %v2509_v5, %v2233_v23 }
 0xc36   :  { %v2189_v60 = vadd.f32 %v2547_v54, %v2114_v59 }
 0xc38   :  { %v2193_v2 = vadd.f32 %v2189_v60, %v3724_v45 }
 0xc3a   :  { %2195 = vst [vmem:[#allocation13 + $0x8] sm:$0xff] %v2193_v2 }
 0xc3b   :  { %3175 = shalt.err (!%p3172_p8)
}
 0xc3c   :  { %s3176_s17 = scalar_lea.hbm %s3779_s13, 256 }
 0xc3d   :  { %p3177_p9 = scmp.ne.s32.totalorder %s3779_s13, %s3176_s17  ;;  %p3180_p10 = scmp.lt.u32.totalorder %s3176_s17, %s3779_s13 }
 0xc3f   :  { %p3182_p11 = pnand %p3180_p10, %p3177_p9 }
 0xc41   :  { %3185 = shalt.err (!%p3182_p11)
}
 0xc42   :  { %2207 = dma.vmem_to_hbm [thread:$0]  %s2202_s26, 256, %s3779_s13, [#allocation7], %s3195_s18, %s3195_s18, %s3196_s19  }
 0xc43   :  { %3192 = dma.done.wait [#allocation7], 256  }
 0xc44   :  { %3193 = vsyncadd [#allocation7], 4294967040 }
 0xc45   :  { %2211 = vsyncpa [#allocation6], 1 }
 0xc46   :  { %2212 = vsyncpa [#allocation9], 1 }
 0xc47   :  { %2213 = vsyncpa [#allocation12], 1 }
 0xc48   :  { %2214 = vsyncpa [#allocation7], 1 }

</bundles_post_ra>
